<compile_context>
chip_gen: v5e
topology: v5e:2x2
jax: 0.10.0
libtpu: 0.0.40
codegen_flags: <defaults>
</compile_context>

<pallas_src>
import functools
import math

import jax
import jax.numpy as jnp
from jax.experimental import pallas as pl
from jax.experimental.pallas import tpu as pltpu

F32_EPS = float(jnp.finfo(jnp.float32).eps)   # matches torch F.rms_norm default eps


# ----------------------------- runtime feature probes -------------------------
def _vmem_limit_bytes():
    # ~75% of per-core VMEM: v5e/v6e (128 MiB) -> ~96 MiB, v7x (64 MiB) -> ~48 MiB.
    try:
        cap = int(pltpu.get_tpu_info().vmem_capacity_bytes)
    except Exception:
        cap = 64 * 1024 * 1024
    return max(32 * 1024 * 1024, (cap * 3) // 4)


VMEM_LIMIT_BYTES = _vmem_limit_bytes()


def _probe_buffered_single():
    # Check that pipeline_mode=pl.Buffered(1) (single-buffer constant weights)
    # is supported by this jax/Mosaic version; otherwise fall back silently.
    def _k(x_ref, o_ref):
        o_ref[...] = x_ref[...] + 1.0
    try:
        spec = pl.BlockSpec((8, 128), lambda i: (0, 0), pipeline_mode=pl.Buffered(1))
        out = pl.pallas_call(
            _k,
            out_shape=jax.ShapeDtypeStruct((8, 128), jnp.float32),
            grid=(1,),
            in_specs=[spec],
            out_specs=pl.BlockSpec((8, 128), lambda i: (0, 0)),
        )(jnp.zeros((8, 128), jnp.float32))
        jax.block_until_ready(out)
        return True
    except Exception:
        return False


_BUFFERED_SINGLE_OK = _probe_buffered_single()


def _const_weight_spec(shape, index_map):
    """BlockSpec for a block whose index never changes -> single-buffer if possible."""
    if _BUFFERED_SINGLE_OK:
        return pl.BlockSpec(shape, index_map, pipeline_mode=pl.Buffered(1))
    return pl.BlockSpec(shape, index_map)


# ----------------------------- in-kernel helpers ------------------------------
def _rms_norm(x, eps=F32_EPS):
    ms = jnp.mean(x * x, axis=-1, keepdims=True)
    return x * jax.lax.rsqrt(ms + eps)


# ----------------------------- QKV projection + QK-norm + RoPE ----------------
def qkv_rope_kernel(x_ref, cos_ref, sin_ref, wqkv_ref, q_ref, k_ref, v_ref,
                    *, num_heads):
    x = x_ref[0]                                        # (TR, E) f32
    TR, E = x.shape
    hd = E // num_heads
    d = hd // 2
    scale = 1.0 / math.sqrt(hd)

    cos = cos_ref[...].astype(jnp.float32).reshape(TR, 1, d)   # broadcast over heads
    sin = sin_ref[...].astype(jnp.float32).reshape(TR, 1, d)

    xn = _rms_norm(x).astype(jnp.bfloat16)
    qkv = jnp.dot(xn, wqkv_ref[...], preferred_element_type=jnp.float32)  # (TR, 3E)

    q = qkv[:, :E].reshape(TR, num_heads, hd)
    k = qkv[:, E:2 * E].reshape(TR, num_heads, hd)
    v = qkv[:, 2 * E:].reshape(TR, num_heads, hd)

    # QK rms_norm + rotary, vectorized over all heads at once.
    q = _rms_norm(q)
    k = _rms_norm(k)

    def rope(t):
        # TODO(synk): lane-axis concatenate could become pltpu.roll + sign mask.
        t1, t2 = t[..., :d], t[..., d:]
        return jnp.concatenate([t1 * cos + t2 * sin, t2 * cos - t1 * sin], axis=-1)

    q = rope(q) * scale          # fold 1/sqrt(hd) into q
    k = rope(k)

    # (TR, H, hd) -> (H, TR, hd): head-batched layout for the flash kernel.
    q_ref[0] = jnp.transpose(q, (1, 0, 2)).astype(jnp.bfloat16)
    k_ref[0] = jnp.transpose(k, (1, 0, 2)).astype(jnp.bfloat16)
    v_ref[0] = jnp.transpose(v, (1, 0, 2)).astype(jnp.bfloat16)


def qkv_rope(x, cos, sin, wqkv_t, *, num_heads, row_tile=256):
    B, S, E = x.shape
    hd = E // num_heads
    d = hd // 2
    TR = S if S <= row_tile else row_tile
    kernel = functools.partial(qkv_rope_kernel, num_heads=num_heads)
    out_sds = tuple(jax.ShapeDtypeStruct((B, num_heads, S, hd), jnp.bfloat16)
                    for _ in range(3))
    q, k, v = pl.pallas_call(
        kernel,
        out_shape=out_sds,
        grid=(B, pl.cdiv(S, TR)),
        in_specs=[
            pl.BlockSpec((1, TR, E), lambda b, r: (b, r, 0)),
            pl.BlockSpec((TR, d), lambda b, r: (r, 0)),
            pl.BlockSpec((TR, d), lambda b, r: (r, 0)),
            _const_weight_spec((E, 3 * E), lambda b, r: (0, 0)),
        ],
        out_specs=[pl.BlockSpec((1, num_heads, TR, hd), lambda b, r: (b, 0, r, 0))
                   for _ in range(3)],
        compiler_params=pltpu.CompilerParams(
            dimension_semantics=("parallel", "parallel"),
            vmem_limit_bytes=VMEM_LIMIT_BYTES),
    )(x, cos, sin, wqkv_t)
    return q, k, v


# ----------------------------- flash attention (+ out-proj + residual) --------
def flash_attn_kernel(q_ref, k_ref, v_ref, x_ref, wo_ref, o_ref,
                      m_sc, l_sc, acc_sc, *, q_tile, kv_tile):
    qi = pl.program_id(1)
    ki = pl.program_id(2)

    @pl.when(ki == 0)
    def _init():
        m_sc[...] = jnp.full_like(m_sc, -jnp.inf)
        l_sc[...] = jnp.zeros_like(l_sc)
        acc_sc[...] = jnp.zeros_like(acc_sc)

    # Skip kv tiles that lie entirely in the causal-masked future of this q tile.
    @pl.when(ki * kv_tile <= qi * q_tile + (q_tile - 1))
    def _compute():
        q = q_ref[0]                                   # (H, TQ, hd) bf16, pre-scaled
        k = k_ref[0]                                   # (H, TK, hd) bf16
        v = v_ref[0]
        s = jnp.einsum('hqd,hkd->hqk', q, k,
                       preferred_element_type=jnp.float32)          # (H, TQ, TK)
        row = jax.lax.broadcasted_iota(jnp.int32, (q_tile, kv_tile), 0) + qi * q_tile
        col = jax.lax.broadcasted_iota(jnp.int32, (q_tile, kv_tile), 1) + ki * kv_tile
        s = jnp.where((col <= row)[None], s, -jnp.inf)

        m_prev = m_sc[...]
        m_new = jnp.maximum(m_prev, jnp.max(s, axis=-1, keepdims=True))
        alpha = jnp.exp(m_prev - m_new)
        p = jnp.exp(s - m_new)
        l_sc[...] = alpha * l_sc[...] + jnp.sum(p, axis=-1, keepdims=True)
        acc_sc[...] = alpha * acc_sc[...] + jnp.einsum(
            'hqk,hkd->hqd', p.astype(jnp.bfloat16), v,
            preferred_element_type=jnp.float32)
        m_sc[...] = m_new

    @pl.when(ki == pl.num_programs(2) - 1)
    def _finalize():
        H, TQ, hd = acc_sc.shape
        o = acc_sc[...] * pl.reciprocal(l_sc[...], approx=True)      # (H, TQ, hd)
        attn = jnp.transpose(o, (1, 0, 2)).reshape(TQ, H * hd).astype(jnp.bfloat16)
        o_ref[0] = x_ref[0] + jnp.dot(attn, wo_ref[...],
                                      preferred_element_type=jnp.float32)


def attention_block(x, q, k, v, wo_t, *, q_tile=256, kv_tile=512):
    B, S, E = x.shape
    H, hd = q.shape[1], q.shape[3]
    TQ = S if S <= q_tile else q_tile
    TK = S if S <= kv_tile else kv_tile
    kernel = functools.partial(flash_attn_kernel, q_tile=TQ, kv_tile=TK)
    return pl.pallas_call(
        kernel,
        out_shape=jax.ShapeDtypeStruct((B, S, E), jnp.float32),
        grid=(B, pl.cdiv(S, TQ), pl.cdiv(S, TK)),
        in_specs=[
            pl.BlockSpec((1, H, TQ, hd), lambda b, i, j: (b, 0, i, 0)),
            pl.BlockSpec((1, H, TK, hd), lambda b, i, j: (b, 0, j, 0)),
            pl.BlockSpec((1, H, TK, hd), lambda b, i, j: (b, 0, j, 0)),
            pl.BlockSpec((1, TQ, E), lambda b, i, j: (b, i, 0)),       # residual
            _const_weight_spec((E, E), lambda b, i, j: (0, 0)),        # Wo
        ],
        out_specs=pl.BlockSpec((1, TQ, E), lambda b, i, j: (b, i, 0)),
        scratch_shapes=[
            pltpu.VMEM((H, TQ, 1), jnp.float32),    # m
            pltpu.VMEM((H, TQ, 1), jnp.float32),    # l
            pltpu.VMEM((H, TQ, hd), jnp.float32),   # acc
        ],
        compiler_params=pltpu.CompilerParams(
            dimension_semantics=("parallel", "parallel", "arbitrary"),
            vmem_limit_bytes=VMEM_LIMIT_BYTES),
    )(q, k, v, x, wo_t)


# ----------------------------- feed-forward (hidden-dim tiled) -----------------
def ff_kernel(x_ref, w1_ref, w2_ref, o_ref, acc_ref, xn_ref, *, final_norm):
    hi = pl.program_id(1)

    @pl.when(hi == 0)
    def _init():
        acc_ref[...] = jnp.zeros_like(acc_ref)
        xn_ref[...] = _rms_norm(x_ref[...]).astype(jnp.bfloat16)   # norm once per row tile

    h = jnp.dot(xn_ref[...], w1_ref[...], preferred_element_type=jnp.float32)
    h = jnp.square(jnp.maximum(h, 0.0)).astype(jnp.bfloat16)       # relu(x)^2
    acc_ref[...] += jnp.dot(h, w2_ref[...], preferred_element_type=jnp.float32)

    @pl.when(hi == pl.num_programs(1) - 1)
    def _finalize():
        y = x_ref[...] + acc_ref[...]
        if final_norm:
            y = _rms_norm(y)          # fused final model-level rms_norm (last layer)
        o_ref[...] = y


def ff_block(x2d, w1_t, w2_t, *, row_tile=1024, hidden_tile=2048, final_norm=False):
    N, E = x2d.shape
    H4 = w1_t.shape[1]
    TR = N if N <= row_tile else row_tile
    TH = H4 if H4 <= hidden_tile else hidden_tile
    kernel = functools.partial(ff_kernel, final_norm=final_norm)
    return pl.pallas_call(
        kernel,
        out_shape=jax.ShapeDtypeStruct((N, E), jnp.float32),
        grid=(pl.cdiv(N, TR), pl.cdiv(H4, TH)),
        in_specs=[
            pl.BlockSpec((TR, E), lambda r, h: (r, 0)),     # rows of x (B*S folded)
            pl.BlockSpec((E, TH), lambda r, h: (0, h)),     # Wff1 hidden tile
            pl.BlockSpec((TH, E), lambda r, h: (h, 0)),     # Wff2 hidden tile
        ],
        out_specs=pl.BlockSpec((TR, E), lambda r, h: (r, 0)),
        scratch_shapes=[
            pltpu.VMEM((TR, E), jnp.float32),               # accumulator
            pltpu.VMEM((TR, E), jnp.bfloat16),              # rms_norm(x), computed once
        ],
        compiler_params=pltpu.CompilerParams(
            dimension_semantics=("parallel", "arbitrary"),
            vmem_limit_bytes=VMEM_LIMIT_BYTES),
    )(x2d, w1_t, w2_t)


# ----------------------------- lm head ----------------------------------------
def lm_head_kernel(x_ref, w_ref, o_ref, *, apply_norm):
    x = x_ref[...]
    if apply_norm:            # only used when n_layers == 0 (norm otherwise fused in FF)
        x = _rms_norm(x)
    o_ref[...] = jnp.dot(x.astype(jnp.bfloat16), w_ref[...],
                         preferred_element_type=jnp.float32)


def lm_head(x2d, w_t, *, row_tile=512, vocab_tile=4096, apply_norm=False):
    N, E = x2d.shape
    V = w_t.shape[1]
    TR = N if N <= row_tile else row_tile
    TV = V if V <= vocab_tile else vocab_tile
    kernel = functools.partial(lm_head_kernel, apply_norm=apply_norm)
    # Vocab axis outermost / row axis innermost: each (E, TV) weight tile is DMAed
    # exactly once; the much smaller (TR, E) activations re-stream instead.
    return pl.pallas_call(
        kernel,
        out_shape=jax.ShapeDtypeStruct((N, V), jnp.float32),
        grid=(pl.cdiv(V, TV), pl.cdiv(N, TR)),
        in_specs=[
            pl.BlockSpec((TR, E), lambda v, r: (r, 0)),
            pl.BlockSpec((E, TV), lambda v, r: (0, v)),
        ],
        out_specs=pl.BlockSpec((TR, TV), lambda v, r: (r, v)),
        compiler_params=pltpu.CompilerParams(
            dimension_semantics=("parallel", "parallel"),
            vmem_limit_bytes=VMEM_LIMIT_BYTES),
    )(x2d, w_t)


# ----------------------------- params / model wrapper --------------------------
def init_params(key, vocab_size, embed, n_layers, n_heads):
    # Deterministic synthetic init. NOTE: the PyTorch __init__ zeroes the
    # attention / FF projection weights; we use small random values so the
    # kernels are exercised with non-trivial data (forward semantics identical
    # for any weight values). Linear weights stored transposed (in, out), bf16.
    keys = jax.random.split(key, 1 + 4 * max(n_layers, 1))
    emb = 0.02 * jax.random.normal(keys[0], (vocab_size, embed), jnp.float32)
    layers = []
    ki = 1
    for _ in range(n_layers):
        def w(shape):
            nonlocal ki
            out = jax.random.normal(keys[ki], shape, jnp.float32) / math.sqrt(shape[0])
            ki += 1
            return out.astype(jnp.bfloat16)
        layers.append(dict(
            wqkv=w((embed, 3 * embed)),          # fused Wq|Wk|Wv
            wo=w((embed, embed)),
            wff1=w((embed, 4 * embed)),
            wff2=w((4 * embed, embed)),
        ))
    return {"emb": emb,
            "lm_head_t": emb.T.astype(jnp.bfloat16),   # tied head, precomputed once
            "layers": layers}


def rotary_tables(seq_len, head_dim, base=10000.0):
    inv_freq = 1.0 / (base ** (jnp.arange(0, head_dim, 2, dtype=jnp.float32) / head_dim))
    t = jnp.arange(seq_len, dtype=jnp.float32)
    freqs = jnp.outer(t, inv_freq)                          # (S, hd//2)
    return jnp.cos(freqs).astype(jnp.bfloat16), jnp.sin(freqs).astype(jnp.bfloat16)


def gpt_forward(params, idx, *, num_heads):
    """Returns (logits_f32 [B, S, V], loss=None) — matches GPTModel.forward(idx)."""
    emb = params["emb"]
    B, S = idx.shape
    V, E = emb.shape
    hd = E // num_heads
    assert E % num_heads == 0 and hd % 2 == 0

    # TODO(synk): embedding gather stays as XLA glue (jnp.take), not a Pallas kernel.
    x = jnp.take(emb, idx, axis=0).astype(jnp.float32)       # (B, S, E)
    cos, sin = rotary_tables(S, hd)

    n_layers = len(params["layers"])
    for li, layer in enumerate(params["layers"]):
        q, k, v = qkv_rope(x, cos, sin, layer["wqkv"], num_heads=num_heads)
        x = attention_block(x, q, k, v, layer["wo"])
        x = ff_block(x.reshape(B * S, E), layer["wff1"], layer["wff2"],
                     final_norm=(li == n_layers - 1)).reshape(B, S, E)

    logits2d = lm_head(x.reshape(B * S, E), params["lm_head_t"],
                       apply_norm=(n_layers == 0))
    logits = logits2d.reshape(B, S, V)
    # TODO(synk): cross-entropy loss branch (targets is not None) and generate()
    # sampling loop are not implemented; forward(idx) returns loss=None.
    return logits, None


# ----------------------------- demo --------------------------------------------
if __name__ == "__main__":
    vocab_size = 64
    embed = 32
    seq_len = 8
    batch = 2
    n_layers = 2
    n_heads = 4

    root = jax.random.PRNGKey(0)
    k_params, k_idx = jax.random.split(root)
    params = init_params(k_params, vocab_size, embed, n_layers, n_heads)
    idx = jax.random.randint(k_idx, (batch, seq_len), 0, vocab_size, dtype=jnp.int32)

    logits, loss = gpt_forward(params, idx, num_heads=n_heads)
    logits = jax.block_until_ready(logits)

    assert logits.shape == (batch, seq_len, vocab_size)
    assert logits.dtype == jnp.float32
    assert loss is None
    assert bool(jnp.all(jnp.isfinite(logits)))
    print("KERNEL_OK")
</pallas_src>

<mosaic_0001>
module attributes {stable_mosaic.version = 11 : i64} {
  func.func @_k(%arg0: i32, %arg1: memref<8x128xf32, #tpu.memory_space<vmem>>, %arg2: memref<8x128xf32, #tpu.memory_space<vmem>>) attributes {dimension_semantics = [#tpu.dimension_semantics<arbitrary>], iteration_bounds = array<i64: 1>, scalar_prefetch = 0 : i64, scratch_operands = 0 : i64, tpu.core_type = #tpu.core_type<tc>, window_params = [{pipeline_mode = #tpu.pipeline_mode<synchronous>, transform_indices = @transform_0, window_bounds = array<i64: 8, 128>}, {pipeline_mode = #tpu.pipeline_mode<synchronous>, transform_indices = @transform_1, window_bounds = array<i64: 8, 128>}]} {
    %c0 = arith.constant 0 : index
    %c0_0 = arith.constant 0 : index
    %0 = vector.load %arg1[%c0, %c0_0] : memref<8x128xf32, #tpu.memory_space<vmem>>, vector<8x128xf32>
    %cst = arith.constant 1.000000e+00 : f32
    %1 = vector.broadcast %cst : f32 to vector<8x128xf32>
    %2 = arith.addf %0, %1 : vector<8x128xf32>
    %c0_1 = arith.constant 0 : index
    %c0_2 = arith.constant 0 : index
    %3 = vector.load %arg2[%c0_1, %c0_2] : memref<8x128xf32, #tpu.memory_space<vmem>>, vector<8x128xf32>
    tpu.vector_store %arg2[%c0_1, %c0_2], %2 {strides = array<i32>} : memref<8x128xf32, #tpu.memory_space<vmem>>, vector<8x128xf32>,
    return
  }
  func.func @transform_0(%arg0: i32) -> (i32, i32) {
    %c0_i32 = arith.constant 0 : i32
    %c0_i32_0 = arith.constant 0 : i32
    %c0_i32_1 = arith.constant 0 : i32
    return %c0_i32, %c0_i32_0 : i32, i32
  }
  func.func @transform_1(%arg0: i32) -> (i32, i32) {
    %c0_i32 = arith.constant 0 : i32
    %c0_i32_0 = arith.constant 0 : i32
    %c0_i32_1 = arith.constant 0 : i32
    return %c0_i32, %c0_i32_0 : i32, i32
  }
}

module attributes {stable_mosaic.version = 11 : i64} {
  func.func @qkv_rope_kernel(%arg0: i32, %arg1: i32, %arg2: memref<1x8x32xf32, #tpu.memory_space<vmem>>, %arg3: memref<8x4xbf16, #tpu.memory_space<vmem>>, %arg4: memref<8x4xbf16, #tpu.memory_space<vmem>>, %arg5: memref<32x96xbf16, #tpu.memory_space<vmem>>, %arg6: memref<1x4x8x8xbf16, #tpu.memory_space<vmem>>, %arg7: memref<1x4x8x8xbf16, #tpu.memory_space<vmem>>, %arg8: memref<1x4x8x8xbf16, #tpu.memory_space<vmem>>) attributes {dimension_semantics = [#tpu.dimension_semantics<parallel>, #tpu.dimension_semantics<parallel>], iteration_bounds = array<i64: 2, 1>, scalar_prefetch = 0 : i64, scratch_operands = 0 : i64, tpu.core_type = #tpu.core_type<tc>, window_params = [{transform_indices = @transform_0, window_bounds = array<i64: 1, 8, 32>}, {transform_indices = @transform_1, window_bounds = array<i64: 8, 4>}, {transform_indices = @transform_2, window_bounds = array<i64: 8, 4>}, {pipeline_mode = #tpu.pipeline_mode<synchronous>, transform_indices = @transform_3, window_bounds = array<i64: 32, 96>}, {transform_indices = @transform_4, window_bounds = array<i64: 1, 4, 8, 8>}, {transform_indices = @transform_5, window_bounds = array<i64: 1, 4, 8, 8>}, {transform_indices = @transform_6, window_bounds = array<i64: 1, 4, 8, 8>}]} {
    %c0 = arith.constant 0 : index
    %c0_0 = arith.constant 0 : index
    %c0_1 = arith.constant 0 : index
    %0 = vector.load %arg2[%c0, %c0_0, %c0_1] : memref<1x8x32xf32, #tpu.memory_space<vmem>>, vector<1x8x32xf32>
    %1 = vector.shape_cast %0 : vector<1x8x32xf32> to vector<8x32xf32>
    %c0_2 = arith.constant 0 : index
    %c0_3 = arith.constant 0 : index
    %2 = vector.load %arg3[%c0_2, %c0_3] : memref<8x4xbf16, #tpu.memory_space<vmem>>, vector<8x4xbf16>
    %3 = arith.extf %2 : vector<8x4xbf16> to vector<8x4xf32>
    %4 = vector.shape_cast %3 : vector<8x4xf32> to vector<8x1x4xf32>
    %c0_4 = arith.constant 0 : index
    %c0_5 = arith.constant 0 : index
    %5 = vector.load %arg4[%c0_4, %c0_5] : memref<8x4xbf16, #tpu.memory_space<vmem>>, vector<8x4xbf16>
    %6 = arith.extf %5 : vector<8x4xbf16> to vector<8x4xf32>
    %7 = vector.shape_cast %6 : vector<8x4xf32> to vector<8x1x4xf32>
    %8 = arith.mulf %1, %1 : vector<8x32xf32>
    %cst = arith.constant dense<0.000000e+00> : vector<8xf32>
    %9 = vector.multi_reduction <add>, %8, %cst [1] : vector<8x32xf32> to vector<8xf32>
    %10 = vector.shape_cast %9 : vector<8xf32> to vector<8x1xf32>
    %cst_6 = arith.constant 3.200000e+01 : f32
    %11 = vector.broadcast %cst_6 : f32 to vector<8x1xf32>
    %12 = arith.divf %10, %11 : vector<8x1xf32>
    %cst_7 = arith.constant 1.1920929E-7 : f32
    %13 = vector.broadcast %cst_7 : f32 to vector<8x1xf32>
    %14 = arith.addf %12, %13 : vector<8x1xf32>
    %15 = math.rsqrt %14 : vector<8x1xf32>
    %16 = vector.broadcast %15 : vector<8x1xf32> to vector<8x32xf32>
    %17 = arith.mulf %1, %16 : vector<8x32xf32>
    %18 = arith.truncf %17 : vector<8x32xf32> to vector<8x32xbf16>
    %c0_8 = arith.constant 0 : index
    %c0_9 = arith.constant 0 : index
    %19 = vector.load %arg5[%c0_8, %c0_9] : memref<32x96xbf16, #tpu.memory_space<vmem>>, vector<32x96xbf16>
    %cst_10 = arith.constant dense<0.000000e+00> : vector<8x96xf32>
    %20 = tpu.matmul %18, %19, %cst_10 {dimension_numbers = #tpu.dot_dimension_numbers<[1], [0], [0], [1], [0, 0, 1, 1], [], []>} : vector<8x32xbf16>, vector<32x96xbf16>, vector<8x96xf32> -> vector<8x96xf32>
    %21 = vector.extract_strided_slice %20 {offsets = [0, 0], sizes = [8, 32], strides = [1, 1]} : vector<8x96xf32> to vector<8x32xf32>
    %22 = vector.shape_cast %21 : vector<8x32xf32> to vector<8x4x8xf32>
    %23 = vector.extract_strided_slice %20 {offsets = [0, 32], sizes = [8, 32], strides = [1, 1]} : vector<8x96xf32> to vector<8x32xf32>
    %24 = vector.shape_cast %23 : vector<8x32xf32> to vector<8x4x8xf32>
    %25 = vector.extract_strided_slice %20 {offsets = [0, 64], sizes = [8, 32], strides = [1, 1]} : vector<8x96xf32> to vector<8x32xf32>
    %26 = vector.shape_cast %25 : vector<8x32xf32> to vector<8x4x8xf32>
    %27 = arith.mulf %22, %22 : vector<8x4x8xf32>
    %cst_11 = arith.constant dense<0.000000e+00> : vector<8x4xf32>
    %28 = vector.multi_reduction <add>, %27, %cst_11 [2] : vector<8x4x8xf32> to vector<8x4xf32>
    %29 = vector.shape_cast %28 : vector<8x4xf32> to vector<8x4x1xf32>
    %cst_12 = arith.constant 8.000000e+00 : f32
    %30 = vector.broadcast %cst_12 : f32 to vector<8x4x1xf32>
    %31 = arith.divf %29, %30 : vector<8x4x1xf32>
    %cst_13 = arith.constant 1.1920929E-7 : f32
    %32 = vector.broadcast %cst_13 : f32 to vector<8x4x1xf32>
    %33 = arith.addf %31, %32 : vector<8x4x1xf32>
    %34 = math.rsqrt %33 : vector<8x4x1xf32>
    %35 = vector.broadcast %34 : vector<8x4x1xf32> to vector<8x4x8xf32>
    %36 = arith.mulf %22, %35 : vector<8x4x8xf32>
    %37 = arith.mulf %24, %24 : vector<8x4x8xf32>
    %cst_14 = arith.constant dense<0.000000e+00> : vector<8x4xf32>
    %38 = vector.multi_reduction <add>, %37, %cst_14 [2] : vector<8x4x8xf32> to vector<8x4xf32>
    %39 = vector.shape_cast %38 : vector<8x4xf32> to vector<8x4x1xf32>
    %cst_15 = arith.constant 8.000000e+00 : f32
    %40 = vector.broadcast %cst_15 : f32 to vector<8x4x1xf32>
    %41 = arith.divf %39, %40 : vector<8x4x1xf32>
    %cst_16 = arith.constant 1.1920929E-7 : f32
    %42 = vector.broadcast %cst_16 : f32 to vector<8x4x1xf32>
    %43 = arith.addf %41, %42 : vector<8x4x1xf32>
    %44 = math.rsqrt %43 : vector<8x4x1xf32>
    %45 = vector.broadcast %44 : vector<8x4x1xf32> to vector<8x4x8xf32>
    %46 = arith.mulf %24, %45 : vector<8x4x8xf32>
    %47 = vector.extract_strided_slice %36 {offsets = [0, 0, 0], sizes = [8, 4, 4], strides = [1, 1, 1]} : vector<8x4x8xf32> to vector<8x4x4xf32>
    %48 = vector.extract_strided_slice %36 {offsets = [0, 0, 4], sizes = [8, 4, 4], strides = [1, 1, 1]} : vector<8x4x8xf32> to vector<8x4x4xf32>
    %49 = vector.broadcast %4 : vector<8x1x4xf32> to vector<8x4x4xf32>
    %50 = arith.mulf %47, %49 : vector<8x4x4xf32>
    %51 = vector.broadcast %7 : vector<8x1x4xf32> to vector<8x4x4xf32>
    %52 = arith.mulf %48, %51 : vector<8x4x4xf32>
    %53 = arith.addf %50, %52 : vector<8x4x4xf32>
    %54 = vector.broadcast %4 : vector<8x1x4xf32> to vector<8x4x4xf32>
    %55 = arith.mulf %48, %54 : vector<8x4x4xf32>
    %56 = vector.broadcast %7 : vector<8x1x4xf32> to vector<8x4x4xf32>
    %57 = arith.mulf %47, %56 : vector<8x4x4xf32>
    %58 = arith.subf %55, %57 : vector<8x4x4xf32>
    %59 = tpu.concatenate %53, %58 in 2 : vector<8x4x4xf32>, vector<8x4x4xf32> -> vector<8x4x8xf32>
    %cst_17 = arith.constant 0.353553385 : f32
    %60 = vector.broadcast %cst_17 : f32 to vector<8x4x8xf32>
    %61 = arith.mulf %59, %60 : vector<8x4x8xf32>
    %62 = vector.extract_strided_slice %46 {offsets = [0, 0, 0], sizes = [8, 4, 4], strides = [1, 1, 1]} : vector<8x4x8xf32> to vector<8x4x4xf32>
    %63 = vector.extract_strided_slice %46 {offsets = [0, 0, 4], sizes = [8, 4, 4], strides = [1, 1, 1]} : vector<8x4x8xf32> to vector<8x4x4xf32>
    %64 = vector.broadcast %4 : vector<8x1x4xf32> to vector<8x4x4xf32>
    %65 = arith.mulf %62, %64 : vector<8x4x4xf32>
    %66 = vector.broadcast %7 : vector<8x1x4xf32> to vector<8x4x4xf32>
    %67 = arith.mulf %63, %66 : vector<8x4x4xf32>
    %68 = arith.addf %65, %67 : vector<8x4x4xf32>
    %69 = vector.broadcast %4 : vector<8x1x4xf32> to vector<8x4x4xf32>
    %70 = arith.mulf %63, %69 : vector<8x4x4xf32>
    %71 = vector.broadcast %7 : vector<8x1x4xf32> to vector<8x4x4xf32>
    %72 = arith.mulf %62, %71 : vector<8x4x4xf32>
    %73 = arith.subf %70, %72 : vector<8x4x4xf32>
    %74 = tpu.concatenate %68, %73 in 2 : vector<8x4x4xf32>, vector<8x4x4xf32> -> vector<8x4x8xf32>
    %75 = tpu.transpose %61, [1, 0, 2] : vector<8x4x8xf32> -> vector<4x8x8xf32>
    %76 = arith.truncf %75 : vector<4x8x8xf32> to vector<4x8x8xbf16>
    %c0_18 = arith.constant 0 : index
    %c0_19 = arith.constant 0 : index
    %c0_20 = arith.constant 0 : index
    %c0_21 = arith.constant 0 : index
    %77 = vector.load %arg6[%c0_18, %c0_19, %c0_20, %c0_21] : memref<1x4x8x8xbf16, #tpu.memory_space<vmem>>, vector<1x4x8x8xbf16>
    %78 = vector.shape_cast %77 : vector<1x4x8x8xbf16> to vector<4x8x8xbf16>
    %79 = vector.shape_cast %76 : vector<4x8x8xbf16> to vector<1x4x8x8xbf16>
    tpu.vector_store %arg6[%c0_18, %c0_19, %c0_20, %c0_21], %79 {strides = array<i32>} : memref<1x4x8x8xbf16, #tpu.memory_space<vmem>>, vector<1x4x8x8xbf16>,
    %80 = tpu.transpose %74, [1, 0, 2] : vector<8x4x8xf32> -> vector<4x8x8xf32>
    %81 = arith.truncf %80 : vector<4x8x8xf32> to vector<4x8x8xbf16>
    %c0_22 = arith.constant 0 : index
    %c0_23 = arith.constant 0 : index
    %c0_24 = arith.constant 0 : index
    %c0_25 = arith.constant 0 : index
    %82 = vector.load %arg7[%c0_22, %c0_23, %c0_24, %c0_25] : memref<1x4x8x8xbf16, #tpu.memory_space<vmem>>, vector<1x4x8x8xbf16>
    %83 = vector.shape_cast %82 : vector<1x4x8x8xbf16> to vector<4x8x8xbf16>
    %84 = vector.shape_cast %81 : vector<4x8x8xbf16> to vector<1x4x8x8xbf16>
    tpu.vector_store %arg7[%c0_22, %c0_23, %c0_24, %c0_25], %84 {strides = array<i32>} : memref<1x4x8x8xbf16, #tpu.memory_space<vmem>>, vector<1x4x8x8xbf16>,
    %85 = tpu.transpose %26, [1, 0, 2] : vector<8x4x8xf32> -> vector<4x8x8xf32>
    %86 = arith.truncf %85 : vector<4x8x8xf32> to vector<4x8x8xbf16>
    %c0_26 = arith.constant 0 : index
    %c0_27 = arith.constant 0 : index
    %c0_28 = arith.constant 0 : index
    %c0_29 = arith.constant 0 : index
    %87 = vector.load %arg8[%c0_26, %c0_27, %c0_28, %c0_29] : memref<1x4x8x8xbf16, #tpu.memory_space<vmem>>, vector<1x4x8x8xbf16>
    %88 = vector.shape_cast %87 : vector<1x4x8x8xbf16> to vector<4x8x8xbf16>
    %89 = vector.shape_cast %86 : vector<4x8x8xbf16> to vector<1x4x8x8xbf16>
    tpu.vector_store %arg8[%c0_26, %c0_27, %c0_28, %c0_29], %89 {strides = array<i32>} : memref<1x4x8x8xbf16, #tpu.memory_space<vmem>>, vector<1x4x8x8xbf16>,
    return
  }
  func.func @transform_0(%arg0: i32, %arg1: i32) -> (i32, i32, i32) {
    %c0_i32 = arith.constant 0 : i32
    %c0_i32_0 = arith.constant 0 : i32
    return %arg0, %arg1, %c0_i32 : i32, i32, i32
  }
  func.func @transform_1(%arg0: i32, %arg1: i32) -> (i32, i32) {
    %c0_i32 = arith.constant 0 : i32
    %c0_i32_0 = arith.constant 0 : i32
    return %arg1, %c0_i32 : i32, i32
  }
  func.func @transform_2(%arg0: i32, %arg1: i32) -> (i32, i32) {
    %c0_i32 = arith.constant 0 : i32
    %c0_i32_0 = arith.constant 0 : i32
    return %arg1, %c0_i32 : i32, i32
  }
  func.func @transform_3(%arg0: i32, %arg1: i32) -> (i32, i32) {
    %c0_i32 = arith.constant 0 : i32
    %c0_i32_0 = arith.constant 0 : i32
    %c0_i32_1 = arith.constant 0 : i32
    return %c0_i32, %c0_i32_0 : i32, i32
  }
  func.func @transform_4(%arg0: i32, %arg1: i32) -> (i32, i32, i32, i32) {
    %c0_i32 = arith.constant 0 : i32
    %c0_i32_0 = arith.constant 0 : i32
    %c0_i32_1 = arith.constant 0 : i32
    return %arg0, %c0_i32, %arg1, %c0_i32_0 : i32, i32, i32, i32
  }
  func.func @transform_5(%arg0: i32, %arg1: i32) -> (i32, i32, i32, i32) {
    %c0_i32 = arith.constant 0 : i32
    %c0_i32_0 = arith.constant 0 : i32
    %c0_i32_1 = arith.constant 0 : i32
    return %arg0, %c0_i32, %arg1, %c0_i32_0 : i32, i32, i32, i32
  }
  func.func @transform_6(%arg0: i32, %arg1: i32) -> (i32, i32, i32, i32) {
    %c0_i32 = arith.constant 0 : i32
    %c0_i32_0 = arith.constant 0 : i32
    %c0_i32_1 = arith.constant 0 : i32
    return %arg0, %c0_i32, %arg1, %c0_i32_0 : i32, i32, i32, i32
  }
}

</mosaic_0001>

<bundles_post_ra>
// kernel: tpu_custom_call.1
= control target key start
LH: loop header
LB: loop body
LE: loop exit
PB: predicated region body
PF: predicated region fallthrough
CT: control target
= control target key end

     0   :  { %6 = vsyncpa [#allocation3], 0  ;;  %s115_s0 = inlined_call_operand.hbm [shape: f32[8,128], index: 0, kind: input, shape index: {}]   ;;  %s116_s1 = inlined_call_operand.hbm [shape: f32[8,128], index: 1, kind: output, shape index: {}]  }
   0x1   :  { %7 = vsyncpa [#allocation4], 0  ;;  %s13_s8 = sshll.u32 %s115_s0, 4  ;;  %s97_s9 = smov [#allocation2]   ;;  %s14_s8 = int_to_ptr.hbm [resolvable:$true] %s13_s8 }
   0x2   :  { %s15_s10 = sshll.u32 %s97_s9, 4  ;;  %s16_s10 = int_to_ptr.vmem [resolvable:$true] %s15_s10 }
   0x3   :  { %18 = dma.hbm_to_vmem [thread:$0]  %s14_s8, 128, %s16_s10, [#allocation3]  }
   0x4   :  { %93 = dma.done.wait [#allocation3], 128  }
   0x5   :  { %94 = vsyncadd [#allocation3], 4294967168  ;;  %s98_s11 = smov [#allocation5]   ;;  %s33_s15 = sshll.u32 %s116_s1, 4  ;;  %v23_v0 = vld [vmem:[#allocation2] sm:$0xff]  ;;  %s34_s15 = int_to_ptr.hbm [resolvable:$true] %s33_s15 }
   0x6   :  { %s31_s12 = sshll.u32 %s98_s11, 4  ;;  %v24_v1 = vadd.f32 1.0, %v23_v0  ;;  %s32_s12 = int_to_ptr.vmem [resolvable:$true] %s31_s12 }
   0x8   :  { %25 = vst [vmem:[#allocation5] sm:$0xff] %v24_v1 }
   0x9   :  { %36 = dma.vmem_to_hbm [thread:$0]  %s32_s12, 128, %s34_s15, [#allocation4]  }
   0xa   :  { %95 = dma.done.wait [#allocation4], 128  }
   0xb   :  { %96 = vsyncadd [#allocation4], 4294967168 }
   0xc   :  { %41 = vsyncpa [#allocation3], 1 }
   0xd   :  { %42 = vsyncpa [#allocation4], 1 }

// kernel: tpu_custom_call.1
= control target key start
LH: loop header
LB: loop body
LE: loop exit
PB: predicated region body
PF: predicated region fallthrough
CT: control target
= control target key end

     0   :  { %s3084_s0 = inlined_call_operand.hbm [shape: f32[2,8,32], index: 0, kind: input, shape index: {}]   ;;  %s3085_s1 = inlined_call_operand.vmem [shape: bf16[8,4], index: 1, kind: input, shape index: {}]   ;;  %s3086_s2 = inlined_call_operand.vmem [shape: bf16[8,4], index: 2, kind: input, shape index: {}]   ;;  %s3087_s3 = inlined_call_operand.hbm [shape: bf16[32,96], index: 3, kind: input, shape index: {}]   ;;  %s3088_s4 = inlined_call_operand.hbm [shape: bf16[2,4,8,8], index: 4, kind: output, shape index: {0}]   ;;  %s3089_s5 = inlined_call_operand.hbm [shape: bf16[2,4,8,8], index: 5, kind: output, shape index: {1}]   ;;  %s3090_s6 = inlined_call_operand.hbm [shape: bf16[2,4,8,8], index: 6, kind: output, shape index: {2}]  }
   0x1   :  { %3118 = sst [smem:[#allocation22_spill]] %s3087_s3 }
   0x2   :  { %12 = vsyncpa [#allocation3], 0 }
   0x3   :  { %14 = vsyncpa [#allocation3 + $0x1], 0 }
   0x4   :  { %15 = vsyncpa [#allocation6], 0 }
   0x5   :  { %16 = vsyncpa [#allocation4], 0 }
   0x6   :  { %18 = vsyncpa [#allocation4 + $0x1], 0 }
   0x7   :  { %19 = vsyncpa [#allocation9], 0 }
   0x8   :  { %21 = vsyncpa [#allocation9 + $0x1], 0  ;;  %s2176_s21 = smov 0   ;;  %s2178_s22 = smov 0  }
   0x9   :  { %s2180_s23 = smov 0   ;;  %s2182_s24 = smov 0  }
   0xa   :  { %s2184_s25 = smov 0   ;;  %s2186_s26 = smov 0  }
   0xb LB: > { %s2207_s27 = sadd.s32 4294967295, %s2125_s26   ;;  %p1697_p0 = scmp.ge.s32.totalorder %s2125_s26, 1  ;;  %s2125_s26 = sphi %s2186_s26, %s27_s26   ;;  %s2121_s25 = sphi %s2184_s25, %s3154_s25   ;;  %s2117_s24 = sphi %s2182_s24, %s3153_s24   ;;  %s2113_s23 = sphi %s2180_s23, %s3152_s23   ;;  %s2109_s22 = sphi %s2178_s22, %s3151_s22   ;;  %s2105_s21 = sphi %s2176_s21, %s3150_s21  }
   0xc   : > { %p62_p1 = scmp.eq.s32.totalorder %s2207_s27, 0  ;;  %p229_p2 = scmp.lt.s32.totalorder %s2125_s26, 3 }
   0xd   : > { %s3119_s3 = sld [smem:[#allocation22_spill]]  ;;  %s2127_s8 = smov [#allocation5]  }
   0xe   : > { %p2215_p3 = pnand %p1697_p0, %p229_p2  ;;  %s256_s9 = sshll.u32 %s2127_s8, 4  ;;  %s257_s9 = int_to_ptr.vmem [resolvable:$true] %s256_s9 }
   0xf   : > { %p1701_p6 = scmp.ge.s32.totalorder %s2125_s26, 2  ;;  %s2128_s10 = smov 64  }
  0x10   : > { %p1747_p4 = pneg %p2215_p3  ;;  %s2129_s11 = smov 4  }
  0x11   : > { %s3091_s12 = sadd.s32 4294967294, %s2125_s26   ;;  %s39_s13 = sadd.s32 1, %s2121_s25 }
  0x12   : > { %p1748_p5 = pnand %p1747_p4, %p62_p1  ;;  %s48_s14 = sadd.s32 1, %s2113_s23 }
  0x13   : > { %s254_s30 = sshll.u32 %s3119_s3, 4  ;;  %p41_p7 = scmp.ge.s32.totalorder %s39_s13, 2  ;;  %s255_s30 = int_to_ptr.hbm [resolvable:$true] %s254_s30 }
  0x14   : > { %1750 = dma.hbm_to_vmem [thread:$0]  (!%p1748_p5), %s255_s30, 256, %s257_s9, [#allocation6], %s2128_s10, %s2128_s10, %s2129_s11  }
  0x15   : > { %p55_p8 = scmp.ne.s32.totalorder %s2113_s23, %s2109_s22  ;;  %p56_p9 = scmp.eq.s32.totalorder %s2125_s26, 0 }
  0x16   : > { %p61_p10 = scmp.ne.s32.totalorder %s2109_s22, %s2105_s21  ;;  %s3156_s13 = smov (%p41_p7, %s39_s13), 0 }
  0x17   : > { %p2234_p11 = por %p56_p9, %p55_p8  ;;  %s43_s17 = ssub.s32 %s2121_s25, %s3156_s13 }
  0x18   : > { %p2240_p12 = por %p62_p1, %p61_p10  ;;  %p160_p13 = scmp.eq.s32.totalorder %s2207_s27, 1 }
  0x19   : > { %p46_p0 = scmp.eq.s32.totalorder %s43_s17, 0  ;;  %p166_p2 = scmp.eq.s32.totalorder %s3091_s12, 1 }
  0x1a   : > { %p2249_p4 = por %p160_p13, %p55_p8  ;;  %p1766_p5 = scmp.lt.s32.totalorder %s2125_s26, 2 }
  0x1b   : > { %s2255_s19 = scalar_select %p46_p0, %s2113_s23, %s48_s14  }
  0x1c   : > { %p2257_p7 = por %p166_p2, %p61_p10  ;;  %s270_s28 = sand.u32 1, %s2113_s23  }
  0x1d   : > { %s1702_s29 = sshll.u32 %s270_s28, 3  ;;  %s1703_s30 = sshll.u32 %s2121_s25, 3 }
  0x1e   : > { %s279_s10 = scalar_lea.hbm %s3084_s0, %s1703_s30  ;;  %s274_s11 = scalar_lea.vmem [#allocation2], %s1702_s29 }
  0x1f   : > { %s283_s17 = sshll.u32 %s274_s11, 4  ;;  %s281_s12 = sshll.u32 %s279_s10, 4  ;;  %s284_s17 = int_to_ptr.vmem [resolvable:$true] %s283_s17  ;;  %s282_s12 = int_to_ptr.hbm [resolvable:$true] %s281_s12 }
  0x20   : > { %p1752_p8 = pnand %p1766_p5, %p2234_p11  ;;  %s271_s14 = scalar_lea.sflag [#allocation3], %s270_s28 }
  0x21   : > { %292 = sbr.rel (%p2215_p3) target bundleno = 889 (0x379), region = 36 }
  0x22   : > { %1754 = dma.hbm_to_vmem [thread:$0]  (!%p1752_p8), %s282_s12, 128, %s284_s17, %s271_s14  }
  0x26   : > { %s2271_s3 = sand.u32 1, %s2109_s22  }
  0x27   : > { %s1705_s8 = sshll.u32 %s2271_s3, 3  ;;  %s295_s30 = scalar_lea.sflag [#allocation3], %s2271_s3 }
  0x28   : > { %s298_s29 = scalar_lea.vmem [#allocation2], %s1705_s8 }
  0x29   : > { %2088 = dma.done.wait (%p2240_p12), %s295_s30, 128  }
  0x2a   : > { %2090 = vsyncadd (%p2240_p12), %s295_s30, 4294967168 }
  0x2b   : > { %2092 = dma.done.wait (%p62_p1), [#allocation6], 256  }
  0x2c   : > { %2094 = vsyncadd (%p62_p1), [#allocation6], 4294967040  ;;  %v2283_v0 = vld [vmem:[%s298_s29] sm:$0xff]  ;;  %vm382_vm0 = vcmask 261120   ;;  %v2130_v3 = vmov 32.0   ;;  %v1731_v7 = vld [vmem:[#allocation5 + $0x8] sm:$0xff] }
  0x2d   : > { %v381_v1 = vmul.f32 %v2283_v0, %v2283_v0  ;;  %1881 = vrcp.f32 %v2130_v3  ;;  %432 = vmatpush.bf16.msra.mxu0 %v1731_v7  ;;  %v1730_v8 = vld [vmem:[#allocation5] sm:$0xff]  ;;  %v371_v11 = vld [vmem:[%s3086_s2] sm:$0xf]  ;;  %s3116_s28 = smov 4   ;;  %s2132_s9 = smov 96   ;;  %vm450_vm5 = vcmask 1047556  }
  0x2e   : > { %v372_v12 = vunpack.c.l.bf16 %v371_v11  ;;  %v361_v16 = vld [vmem:[%s3085_s1] sm:$0xf]  ;;  %s2133_s10 = smov 112   ;;  %s2134_s11 = smov 120   ;;  %vm650_vm6 = vcmask 60416  }
  0x2f   : > { %v383_v2 = vsel %vm382_vm0, %v381_v1, 0.0  ;;  %v362_v27 = vunpack.c.l.bf16 %v361_v16  ;;  %s2135_s17 = smov 104   ;;  %s3114_s14 = smov 64  }
  0x30   : > { %384 = vadd.xlane.f32.xlu0 %v383_v2  ;;  %v374_v14 = vrot.slane %v372_v12, 1  ;;  %v2291_v15 = vperm.slane %v372_v12, 0  ;;  %v375_v17 = vrot.slane %v372_v12, 2  ;;  %v376_v18 = vrot.slane %v372_v12, 3  ;;  %s2555_s8 = sshll.u32 %s2271_s3, 4  ;;  %s2140_s29 = smov 124  }
  0x31   : > { %433 = vmatpush.bf16.msra.mxu0 %v1730_v8  ;;  %v379_v21 = vrot.slane %v372_v12, 6  ;;  %v380_v22 = vrot.slane %v372_v12, 7  ;;  %v377_v23 = vrot.slane %v372_v12, 4  ;;  %v378_v29 = vrot.slane %v372_v12, 5  ;;  %s2567_s30 = scalar_lea.vmem [#allocation10], %s2555_s8  ;;  %s2899_s7 = sshll.u32 %s2117_s24, 4 }
  0x32   : > { %v2296_v20 = vperm.slane %v374_v14, 0  ;;  %v2298_v25 = vperm.slane %v375_v17, 0  ;;  %v2300_v26 = vperm.slane %v376_v18, 0  ;;  %v367_v33 = vrot.slane %v362_v27, 4  ;;  %s1464_s16 = scalar_lea.hbm %s3088_s4, %s2899_s7  ;;  %s336_s24 = scalar_lea.vmem [#allocation7], %s2555_s8 }
  0x33   : > { %v1882_v4 = vpop.eup %1881  ;;  %v2304_v30 = vperm.slane %v377_v23, 0  ;;  %v2309_v34 = vperm.slane %v379_v21, 0  ;;  %v2311_v35 = vperm.slane %v380_v22, 0  ;;  %v2313_v36 = vperm.slane %v378_v29, 0 }
  0x34   : > { %v387_v5 = vmul.f32 32.0, %v1882_v4  ;;  %vm391_vm1 = vweird.f32 %v1882_v4  ;;  %v1831_v28 = vpack.i.bf16 %v2296_v20, %v2291_v15  ;;  %v1836_v32 = vpack.i.bf16 %v2300_v26, %v2298_v25 }
  0x35   : > { %v368_v37 = vrot.slane %v362_v27, 5  ;;  %v2316_v38 = vperm.slane %v367_v33, 0  ;;  %v365_v39 = vrot.slane %v362_v27, 2  ;;  %v1841_v40 = vpack.i.bf16 %v2313_v36, %v2304_v30 }
  0x36   : > { %v388_v6 = vsub.f32 1.0, %v387_v5  ;;  %1832 = vrot.lane.b32.xlu2 %v1831_v28, %s3116_s28  ;;  %1837 = vrot.lane.b32.xlu1 %v1836_v32, %s3116_s28  ;;  %v366_v42 = vrot.slane %v362_v27, 3  ;;  %v1846_v43 = vpack.i.bf16 %v2311_v35, %v2309_v34  ;;  %v364_v44 = vrot.slane %v362_v27, 1 }
  0x37   : > { %v2320_v41 = vperm.slane %v368_v37, 0  ;;  %v2325_v45 = vperm.slane %v365_v39, 0  ;;  %v2332_v50 = vperm.slane %v362_v27, 0  ;;  %v369_v56 = vrot.slane %v362_v27, 6 }
  0x38   : > { %v389_v9 = vmul.f32 %v1882_v4, %v388_v6  ;;  %v2329_v47 = vperm.slane %v366_v42, 0  ;;  %v2334_v51 = vperm.slane %v364_v44, 0  ;;  %v370_v57 = vrot.slane %v362_v27, 7 }
  0x39   : > { %v1861_v46 = vpack.i.bf16 %v2320_v41, %v2316_v38  ;;  %v2343_v60 = vperm.slane %v369_v56, 0  ;;  %v2136_v8 = vmov 1983009808   ;;  %v2137_v17 = vmov 1934713408  }
  0x3a   : > { %v390_v10 = vadd.f32 %v1882_v4, %v389_v9  ;;  %3125 = vst [vmem:[#allocation15_spill] sm:$0xff] %v2329_v47  ;;  %v1856_v52 = vpack.i.bf16 %v2329_v47, %v2325_v45  ;;  %v1851_v55 = vpack.i.bf16 %v2334_v51, %v2332_v50  ;;  %v2345_v61 = vperm.slane %v370_v57, 0 }
  0x3b   : > { %3126 = vst [vmem:[#allocation16_spill] sm:$0xff] %v2334_v51  ;;  %v455_v9 = vunpack.c.l.s4 %v2136_v8  ;;  %v479_v18 = vunpack.c.l.s4 %v2137_v17 }
  0x3c   : > { %v392_v13 = vsel %vm391_vm1, %v1882_v4, %v390_v10  ;;  %3127 = vst [vmem:[#allocation17_spill] sm:$0xff] %v2345_v61  ;;  %v1866_v1 = vpack.i.bf16 %v2345_v61, %v2343_v60 }
  0x3e   : > { %1847 = vrot.lane.b32.xlu2 %v1846_v43, %s3116_s28  ;;  %1862 = vrot.lane.b32.xlu1 %v1861_v46, %s3116_s28 }
  0x44   : > { %1842 = vrot.lane.b32.xlu0 %v1841_v40, %s3116_s28 }
  0x46   : > { %1852 = vrot.lane.b32.xlu2 %v1851_v55, %s3116_s28 }
  0x4c   : > { %1857 = vrot.lane.b32.xlu0 %v1856_v52, %s3116_s28 }
  0x4e   : > { %1867 = vrot.lane.b32.xlu2 %v1866_v1, %s3116_s28 }
  0xa3   : > { %v385_v19 = vpop.xlane.xlu0 %384 }
  0xa4   : > { %v393_v24 = vmul.f32 %v392_v13, %v385_v19  ;;  %v2362_v13 = vunpack.c.0.s8 %v455_v9  ;;  %v2411_v9 = vpop.permute.xlu2 %1832 }
  0xa6   : > { %v394_v31 = vadd.f32 1.1920929e-07, %v393_v24  ;;  %3128 = vst [vmem:[#allocation18_spill] sm:$0xff] %v2362_v13 }
  0xa8   : > { %1883 = vrsqrt.f32 %v394_v31  ;;  %vm401_vm3 = vweird.f32 %v394_v31 }
  0xae   : > { %v1884_v48 = vpop.eup %1883 }
  0xaf   : > { %v396_v49 = vmul.f32 %v1884_v48, %v394_v31  ;;  %vm402_vm2 = vweird.f32 %v1884_v48  ;;  %v2371_v31 = vunpack.c.0.s8 %v479_v18  ;;  %v2424_v18 = vpop.permute.xlu2 %1847 }
  0xb0   : > { %vm403_vm4 = vmor %vm401_vm3, %vm402_vm2 }
  0xb1   : > { %v397_v53 = vmul.f32 %v1884_v48, %v396_v49  ;;  %3129 = vst [vmem:[#allocation19_spill] sm:$0xff] %v2371_v31 }
  0xb3   : > { %v398_v54 = vmul.f32 0.5, %v397_v53 }
  0xb5   : > { %v399_v58 = vsub.f32 1.5, %v398_v54 }
  0xb6   : > { %v2355_v5 = vpop.permute.xlu0 %1842 }
  0xb7   : > { %v400_v59 = vmul.f32 %v1884_v48, %v399_v58 }
  0xb9   : > { %v404_v62 = vsel %vm403_vm4, %v1884_v48, %v400_v59 }
  0xba   : > { %v405_v63 = vmul.f32 %v404_v62, %v2283_v0  ;;  %v2353_v0 = vpop.permute.xlu1 %1837 }
  0xbc   : > { %v406_v2 = vpack.c.bf16 %v405_v63, %v405_v63 }
  0xbe   : > { %1718 = vmatmul.msk.bf16.vlgmr.msra.gmra.mxu0 %vm382_vm0, %v406_v2  ;;  %v2359_v7 = vpop.permute.xlu0 %1857 }
  0xc2   : > { %v2357_v6 = vpop.permute.xlu1 %1862 }
 0x13b   : > { %v435_v3 = vpop.f32.mrf.mxu0 }
 0x13c   : > { %506 = vrot.lane.b32.xlu2 %v435_v3, %s2132_s9  ;;  %443 = vrot.lane.b32.xlu1 %v435_v3, %s2133_s10  ;;  %v452_v11 = vrot.slane %v435_v3, 4  ;;  %s2913_s10 = sshll.u32 %s1464_s16, 4  ;;  %s1999_s16 = scalar_lea.hbm %s3088_s4, 32  ;;  %s1468_s10 = int_to_ptr.hbm [resolvable:$true] %s2913_s10 }
 0x13d   : > { %440 = vrot.lane.b32.xlu0 %v435_v3, %s2134_s11  ;;  %s1442_s11 = scalar_lea.sflag [#allocation4], %s2271_s3 }
 0x143   : > { %v437_v4 = vpop.f32.mrf.mxu0 }
 0x144   : > { %446 = vrot.lane.b32.xlu1 %v435_v3, %s2135_s17  ;;  %s1993_s17 = sshra.s32 %s1468_s10, 4  ;;  %s1994_s17 = int_to_ptr.hbm [resolvable:$true] %s1993_s17 }
 0x145   : > { %p2000_p10 = scmp.lt.s32.totalorder %s1994_s17, %s3088_s4 }
 0x1ae   : > { %v444_v10 = vpop.permute.xlu1 %443 }
 0x1af   : > { %v441_v12 = vpop.permute.xlu0 %440  ;;  %510 = vrot.lane.b32.xlu1 %v444_v10, %s2132_s9  ;;  %v449_v14 = vrot.slane %v444_v10, 4  ;;  %v453_v16 = vsel %vm450_vm5, %v444_v10, %v452_v11 }
 0x1b0   : > { %508 = vrot.lane.b32.xlu2 %v441_v12, %s2132_s9  ;;  %v461_v21 = vperm.slane %v453_v16, %v2362_v13  ;;  %v464_v22 = vrot.slane %v441_v12, 4  ;;  %v1871_v23 = vpack.i.bf16 %v441_v12, %v435_v3 }
 0x1b1   : > { %v451_v19 = vsel %vm450_vm5, %v449_v14, %v435_v3 }
 0x1b2   : > { %v457_v27 = vperm.slane %v451_v19, %v2362_v13  ;;  %v488_v32 = vrot.slane %v461_v21, 4 }
 0x1b4   : > { %v476_v42 = vrot.slane %v457_v27, 4 }
 0x1b6   : > { %v447_v24 = vpop.permute.xlu1 %446 }
 0x1b7   : > { %v462_v28 = vrot.slane %v447_v24, 4  ;;  %v465_v29 = vsel %vm450_vm5, %v447_v24, %v464_v22  ;;  %1872 = vrot.lane.b32.xlu1 %v1871_v23, %s3114_s14  ;;  %v1876_v49 = vpack.i.bf16 %v447_v24, %v444_v10 }
 0x1b8   : > { %v473_v33 = vperm.slane %v465_v29, %v2362_v13  ;;  %512 = vrot.lane.b32.xlu2 %v447_v24, %s2132_s9  ;;  %v2431_v24 = vpop.permute.xlu2 %1852  ;;  %s1465_s9 = sshll.u32 %s336_s24, 4  ;;  %s1466_s9 = int_to_ptr.vmem [resolvable:$true] %s1465_s9 }
 0x1b9   : > { %v463_v37 = vsel %vm450_vm5, %v462_v28, %v441_v12 }
 0x1ba   : > { %v469_v39 = vperm.slane %v463_v37, %v2362_v13  ;;  %v489_v40 = vsel %vm450_vm5, %v473_v33, %v488_v32  ;;  %v486_v1 = vrot.slane %v473_v33, 4 }
 0x1bb   : > { %v2379_v43 = vperm.slane %v489_v40, %v2371_v31  ;;  %v2139_v40 = vmov 8.0  }
 0x1bc   : > { %v474_v44 = vrot.slane %v469_v39, 4  ;;  %v477_v48 = vsel %vm450_vm5, %v469_v39, %v476_v42  ;;  %v487_v3 = vsel %vm450_vm5, %v486_v1, %v461_v21  ;;  %1885 = vrcp.f32 %v2139_v40 }
 0x1bd   : > { %v648_v46 = vmul.f32 %v2379_v43, %v2379_v43  ;;  %v2391_v55 = vperm.slane %v477_v48, %v2371_v31  ;;  %v2409_v8 = vperm.slane %v487_v3, %v2371_v31  ;;  %v504_v23 = vrot.slane %v2379_v43, 4 }
 0x1be   : > { %v475_v52 = vsel %vm450_vm5, %v474_v44, %v457_v27 }
 0x1bf   : > { %v669_v53 = vsel %vm650_vm6, %v648_v46, 0.0  ;;  %v2387_v54 = vperm.slane %v475_v52, %v2371_v31  ;;  %v500_v57 = vrot.slane %v2391_v55, 4  ;;  %v502_v11 = vrot.slane %v2409_v8, 4 }
 0x1c0   : > { %1877 = vrot.lane.b32.xlu2 %v1876_v49, %s3114_s14  ;;  %670 = vadd.xlane.f32.xlu0 %v669_v53  ;;  %v644_v16 = vmul.f32 %v2391_v55, %v2391_v55  ;;  %v646_v22 = vmul.f32 %v2409_v8, %v2409_v8  ;;  %v2435_v28 = vsel %vm450_vm5, 0.0, %v504_v23  ;;  %v2440_v33 = vpop.permute.xlu2 %1867 }
 0x1c1   : > { %v642_v56 = vmul.f32 %v2387_v54, %v2387_v54  ;;  %v2398_v59 = vsel %vm450_vm5, 0.0, %v500_v57  ;;  %v498_v2 = vrot.slane %v2387_v54, 4  ;;  %v2418_v14 = vsel %vm450_vm5, 0.0, %v502_v11 }
 0x1c2   : > { %v645_v62 = vmul.f32 %v2398_v59, %v2398_v59  ;;  %v647_v17 = vmul.f32 %v2418_v14, %v2418_v14  ;;  %v657_v19 = vsel %vm650_vm6, %v644_v16, 0.0  ;;  %v663_v27 = vsel %vm650_vm6, %v646_v22, 0.0  ;;  %v2442_v44 = vpop.eup %1885 }
 0x1c3   : > { %v651_v58 = vsel %vm650_vm6, %v642_v56, 0.0  ;;  %v2406_v4 = vsel %vm450_vm5, 0.0, %v498_v2  ;;  %v649_v29 = vmul.f32 %v2435_v28, %v2435_v28  ;;  %v676_v52 = vmul.f32 8.0, %v2442_v44 }
 0x1c4   : > { %v660_v63 = vsel %vm650_vm6, %v645_v62, 0.0  ;;  %v643_v10 = vmul.f32 %v2406_v4, %v2406_v4  ;;  %v666_v21 = vsel %vm650_vm6, %v647_v17, 0.0  ;;  %vm680_vm7 = vweird.f32 %v2442_v44 }
 0x1c5   : > { %v672_v32 = vsel %vm650_vm6, %v649_v29, 0.0  ;;  %v677_v62 = vsub.f32 1.0, %v676_v52 }
 0x1c6   : > { %v654_v12 = vsel %vm650_vm6, %v643_v10, 0.0 }
 0x1c8   : > { %652 = vadd.xlane.f32.xlu0 %v651_v58  ;;  %v507_v37 = vpop.permute.xlu2 %506 }
 0x1c9   : > { %v520_v57 = vrot.slane %v507_v37, 4 }
 0x1d0   : > { %661 = vadd.xlane.f32.xlu0 %v660_v63 }
 0x1e1   : > { %655 = vadd.xlane.f32.xlu1 %v654_v12 }
 0x1e9   : > { %658 = vadd.xlane.f32.xlu2 %v657_v19  ;;  %667 = vadd.xlane.f32.xlu1 %v666_v21  ;;  %v678_v19 = vmul.f32 %v2442_v44, %v677_v62 }
 0x1f1   : > { %664 = vadd.xlane.f32.xlu2 %v663_v27 }
 0x1f9   : > { %673 = vadd.xlane.f32.xlu2 %v672_v32 }
 0x20a   : > { %v509_v39 = vpop.permute.xlu2 %508 }
 0x20b   : > { %v532_v48 = vrot.slane %v509_v39, 4 }
 0x212   : > { %v513_v42 = vpop.permute.xlu2 %512 }
 0x213   : > { %v530_v46 = vrot.slane %v513_v42, 4  ;;  %v533_v49 = vsel %vm450_vm5, %v513_v42, %v532_v48 }
 0x214   : > { %v541_v56 = vperm.slane %v533_v49, %v2362_v13 }
 0x215   : > { %v531_v53 = vsel %vm450_vm5, %v530_v46, %v509_v39  ;;  %v679_v46 = vadd.f32 %v2442_v44, %v678_v19 }
 0x216   : > { %v537_v58 = vperm.slane %v531_v53, %v2362_v13  ;;  %v554_v10 = vrot.slane %v541_v56, 4 }
 0x218   : > { %v542_v12 = vrot.slane %v537_v58, 4 }
 0x21a   : > { %v1878_v63 = vpop.permute.xlu2 %1877 }
 0x21b   : > { %v1880_v16 = vunpack.i.h.bf16 %v1878_v63  ;;  %v1879_v21 = vunpack.i.l.bf16 %v1878_v63 }
 0x21d   : > { %v598_v49 = vrot.slane %v1880_v16, 4  ;;  %v586_v52 = vrot.slane %v1879_v21, 4 }
 0x221   : > { %v511_v1 = vpop.permute.xlu1 %510 }
 0x222   : > { %v518_v2 = vrot.slane %v511_v1, 4  ;;  %v521_v3 = vsel %vm450_vm5, %v511_v1, %v520_v57 }
 0x223   : > { %v529_v11 = vperm.slane %v521_v3, %v2362_v13 }
 0x224   : > { %v519_v17 = vsel %vm450_vm5, %v518_v2, %v507_v37 }
 0x225   : > { %v525_v22 = vperm.slane %v519_v17, %v2362_v13  ;;  %v555_v23 = vsel %vm450_vm5, %v554_v10, %v529_v11  ;;  %v556_v27 = vrot.slane %v529_v11, 4 }
 0x226   : > { %v2456_v29 = vperm.slane %v555_v23, %v2371_v31 }
 0x227   : > { %v544_v32 = vrot.slane %v525_v22, 4  ;;  %v557_v39 = vsel %vm450_vm5, %v541_v56, %v556_v27  ;;  %v543_v40 = vsel %vm450_vm5, %v542_v12, %v525_v22 }
 0x228   : > { %v790_v42 = vmul.f32 %v2456_v29, %v2456_v29  ;;  %v2463_v37 = vperm.slane %v557_v39, %v2371_v31  ;;  %v570_v48 = vrot.slane %v2456_v29, 4  ;;  %v2469_v62 = vperm.slane %v543_v40, %v2371_v31 }
 0x229   : > { %v1873_v53 = vpop.permute.xlu1 %1872  ;;  %v545_v57 = vsel %vm450_vm5, %v537_v58, %v544_v32 }
 0x22a   : > { %v1875_v56 = vunpack.i.h.bf16 %v1873_v53  ;;  %v1874_v63 = vunpack.i.l.bf16 %v1873_v53  ;;  %v806_v1 = vsel %vm650_vm6, %v790_v42, 0.0  ;;  %v792_v2 = vmul.f32 %v2463_v37, %v2463_v37 }
 0x22b   : > { %807 = vadd.xlane.f32.xlu0 %v806_v1  ;;  %v2475_v3 = vperm.slane %v545_v57, %v2371_v31  ;;  %v572_v10 = vrot.slane %v2463_v37, 4  ;;  %v2480_v58 = vsel %vm450_vm5, 0.0, %v570_v48  ;;  %v786_v48 = vmul.f32 %v2469_v62, %v2469_v62 }
 0x22c   : > { %v600_v11 = vrot.slane %v1875_v56, 4  ;;  %v587_v12 = vsel %vm450_vm5, %v586_v52, %v1874_v63  ;;  %v588_v17 = vrot.slane %v1874_v63, 4  ;;  %v599_v19 = vsel %vm450_vm5, %v598_v49, %v1875_v56 }
 0x22d   : > { %v593_v22 = vperm.slane %v587_v12, %v2362_v13  ;;  %v605_v23 = vperm.slane %v599_v19, %v2362_v13  ;;  %v812_v27 = vsel %vm650_vm6, %v792_v2, 0.0  ;;  %v788_v32 = vmul.f32 %v2475_v3, %v2475_v3 }
 0x22e   : > { %v589_v39 = vsel %vm450_vm5, %v1879_v21, %v588_v17  ;;  %v601_v40 = vsel %vm450_vm5, %v1880_v16, %v600_v11  ;;  %813 = vadd.xlane.f32.xlu1 %v812_v27  ;;  %v2492_v42 = vsel %vm450_vm5, 0.0, %v572_v10  ;;  %v791_v16 = vmul.f32 %v2480_v58, %v2480_v58 }
 0x22f   : > { %v597_v49 = vperm.slane %v589_v39, %v2362_v13  ;;  %v609_v52 = vperm.slane %v601_v40, %v2362_v13  ;;  %v610_v53 = vrot.slane %v605_v23, 4  ;;  %v612_v57 = vrot.slane %v593_v22, 4 }
 0x230   : > { %v800_v56 = vsel %vm650_vm6, %v788_v32, 0.0  ;;  %v793_v21 = vmul.f32 %v2492_v42, %v2492_v42  ;;  %v566_v63 = vrot.slane %v2469_v62, 4  ;;  %v2511_v19 = vsel %vm680_vm7, %v2442_v44, %v679_v46 }
 0x231   : > { %v611_v1 = vsel %vm450_vm5, %v610_v53, %v593_v22  ;;  %v613_v2 = vsel %vm450_vm5, %v605_v23, %v612_v57  ;;  %v622_v10 = vrot.slane %v609_v52, 4  ;;  %v624_v11 = vrot.slane %v597_v49, 4  ;;  %801 = vadd.xlane.f32.xlu2 %v800_v56 }
 0x232   : > { %v617_v12 = vperm.slane %v611_v1, %v2371_v31  ;;  %v621_v17 = vperm.slane %v613_v2, %v2371_v31  ;;  %v815_v27 = vsel %vm650_vm6, %v793_v21, 0.0  ;;  %v2517_v23 = vsel %vm450_vm5, 0.0, %v566_v63 }
 0x233   : > { %v623_v32 = vsel %vm450_vm5, %v622_v10, %v597_v49  ;;  %v625_v22 = vsel %vm450_vm5, %v609_v52, %v624_v11  ;;  %v671_v39 = vpop.xlane.xlu0 %670  ;;  %816 = vadd.xlane.f32.xlu0 %v815_v27  ;;  %v568_v40 = vrot.slane %v2475_v3, 4  ;;  %v794_v21 = vsel %vm650_vm6, %v786_v48, 0.0 }
 0x234   : > { %v629_v53 = vperm.slane %v623_v32, %v2371_v31  ;;  %v633_v57 = vperm.slane %v625_v22, %v2371_v31  ;;  %v634_v56 = vrot.slane %v617_v12, 4  ;;  %v636_v44 = vrot.slane %v621_v17, 4 }
 0x235   : > { %v688_v46 = vmul.f32 %v2511_v19, %v671_v39  ;;  %v809_v49 = vsel %vm650_vm6, %v791_v16, 0.0  ;;  %v787_v52 = vmul.f32 %v2517_v23, %v2517_v23  ;;  %v2529_v10 = vsel %vm450_vm5, 0.0, %v568_v40 }
 0x236   : > { %v637_v63 = vsel %vm450_vm5, 0.0, %v636_v44  ;;  %v638_v1 = vrot.slane %v629_v53, 4  ;;  %v640_v2 = vrot.slane %v633_v57, 4  ;;  %795 = vadd.xlane.f32.xlu1 %v794_v21  ;;  %v635_v11 = vsel %vm450_vm5, 0.0, %v634_v56 }
 0x237   : > { %v1379_v17 = vsel %vm450_vm5, %v636_v44, %v617_v12  ;;  %v1384_v27 = vrot.slane %v637_v63, 4  ;;  %v2533_v32 = vadd.f32 1.1920929e-07, %v688_v46  ;;  %v797_v39 = vsel %vm650_vm6, %v787_v52, 0.0 }
 0x238   : > { %v641_v48 = vsel %vm450_vm5, 0.0, %v640_v2  ;;  %v1383_v16 = vperm.slane %v1379_v17, %v2362_v13  ;;  %v1390_v22 = vsel %vm450_vm5, %v640_v2, %v629_v53  ;;  %v639_v12 = vsel %vm450_vm5, 0.0, %v638_v1 }
 0x239   : > { %v1385_v57 = vsel %vm450_vm5, %v1384_v27, %v635_v11  ;;  %v1394_v40 = vperm.slane %v1390_v22, %v2362_v13  ;;  %v1395_v21 = vrot.slane %v641_v48, 4  ;;  %1887 = vrsqrt.f32 %v2533_v32  ;;  %810 = vadd.xlane.f32.xlu2 %v809_v49 }
 0x23a   : > { %v1389_v56 = vperm.slane %v1385_v57, %v2362_v13  ;;  %v1403_v44 = vrot.slane %v1383_v16, 4  ;;  %v789_v46 = vmul.f32 %v2529_v10, %v2529_v10  ;;  %vm764_vm9 = vweird.f32 %v2533_v32 }
 0x23b   : > { %v1396_v53 = vsel %vm450_vm5, %v1395_v21, %v639_v12  ;;  %v1415_v52 = vrot.slane %v1394_v40, 4  ;;  %v653_v63 = vpop.xlane.xlu0 %652  ;;  %798 = vadd.xlane.f32.xlu0 %v797_v39 }
 0x23c   : > { %v1400_v2 = vperm.slane %v1396_v53, %v2362_v13  ;;  %v1401_v11 = vrot.slane %v1389_v56, 4  ;;  %v1404_v17 = vsel %vm450_vm5, %v1389_v56, %v1403_v44  ;;  %v682_v49 = vmul.f32 %v2511_v19, %v653_v63 }
 0x23d   : > { %v1412_v1 = vperm.slane %v1404_v17, %v2371_v31  ;;  %v803_v27 = vsel %vm650_vm6, %v789_v46, 0.0 }
 0x23e   : > { %v1402_v48 = vsel %vm450_vm5, %v1401_v11, %v1383_v16  ;;  %v1413_v22 = vrot.slane %v1400_v2, 4  ;;  %v1416_v57 = vsel %vm450_vm5, %v1400_v2, %v1415_v52  ;;  %v690_v21 = vadd.f32 1.1920929e-07, %v682_v49  ;;  %804 = vadd.xlane.f32.xlu1 %v803_v27 }
 0x23f   : > { %v1888_v39 = vpop.eup %1887  ;;  %v1408_v12 = vperm.slane %v1402_v48, %v2371_v31  ;;  %v1424_v56 = vperm.slane %v1416_v57, %v2371_v31  ;;  %v1431_v44 = vrot.slane %v1412_v1, 4 }
 0x240   : > { %v1414_v53 = vsel %vm450_vm5, %v1413_v22, %v1394_v40  ;;  %v759_v63 = vmul.f32 %v1888_v39, %v2533_v32  ;;  %1889 = vrsqrt.f32 %v690_v21  ;;  %vm765_vm8 = vweird.f32 %v1888_v39 }
 0x241   : > { %v1420_v16 = vperm.slane %v1414_v53, %v2371_v31  ;;  %v1427_v46 = vrot.slane %v1408_v12, 4  ;;  %v1429_v52 = vrot.slane %v1424_v56, 4  ;;  %v1432_v2 = vsel %vm450_vm5, %v1424_v56, %v1431_v44  ;;  %vm766_vm10 = vmor %vm764_vm9, %vm765_vm8 }
 0x242   : > { %v1436_v11 = vpack.c.bf16 %v1432_v2, %v1432_v2  ;;  %v760_v17 = vmul.f32 %v1888_v39, %v759_v63  ;;  %vm704_vm12 = vweird.f32 %v690_v21 }
 0x243   : > { %v1425_v49 = vrot.slane %v1420_v16, 4  ;;  %v1428_v27 = vsel %vm450_vm5, %v1420_v16, %v1427_v46  ;;  %v1430_v48 = vsel %vm450_vm5, %v1429_v52, %v1412_v1  ;;  %v662_v57 = vpop.xlane.xlu0 %661 }
 0x244   : > { %v1434_v51 = vpack.c.bf16 %v1428_v27, %v1428_v27  ;;  %v1435_v40 = vpack.c.bf16 %v1430_v48, %v1430_v48  ;;  %v761_v22 = vmul.f32 0.5, %v760_v17  ;;  %v685_v47 = vmul.f32 %v2511_v19, %v662_v57  ;;  %1440 = vst.msk [vmem:[%s2567_s30 + $0xc] sm:$0xf] %vm650_vm6, %v1436_v11 }
 0x245   : > { %v1426_v56 = vsel %vm450_vm5, %v1425_v49, %v1408_v12  ;;  %v3103_v12 = vunpack.i.l.bf16 %v2424_v18 }
 0x246   : > { %v1890_v44 = vpop.eup %1889  ;;  %v1433_v53 = vpack.c.bf16 %v1426_v56, %v1426_v56  ;;  %v762_v63 = vsub.f32 1.5, %v761_v22  ;;  %v693_v1 = vadd.f32 1.1920929e-07, %v685_v47  ;;  %1438 = vst.msk [vmem:[%s2567_s30 + $0x4] sm:$0xf] %vm650_vm6, %v1434_v51 }
 0x247   : > { %v699_v16 = vmul.f32 %v1890_v44, %v690_v21  ;;  %1439 = vst.msk [vmem:[%s2567_s30 + $0x8] sm:$0xf] %vm650_vm6, %v1435_v40  ;;  %vm705_vm11 = vweird.f32 %v1890_v44 }
 0x248   : > { %v763_v46 = vmul.f32 %v1888_v39, %v762_v63  ;;  %1891 = vrsqrt.f32 %v693_v1  ;;  %1437 = vst.msk [vmem:[%s2567_s30] sm:$0xf] %vm650_vm6, %v1433_v53  ;;  %vm706_vm13 = vmor %vm704_vm12, %vm705_vm11  ;;  %vm734_vm15 = vweird.f32 %v693_v1 }
 0x249   : > { %v700_v52 = vmul.f32 %v1890_v44, %v699_v16 }
 0x24a   : > { %v767_v2 = vsel %vm766_vm10, %v1888_v39, %v763_v46 }
 0x24b   : > { %v2581_v11 = vmul.f32 %v767_v2, %v2379_v43  ;;  %v701_v47 = vmul.f32 0.5, %v700_v52  ;;  %v3101_v43 = vunpack.i.l.bf16 %v2411_v9 }
 0x24d   : > { %v702_v17 = vsub.f32 1.5, %v701_v47  ;;  %v992_v51 = vmul.f32 %v3103_v12, %v2581_v11  ;;  %v1072_v21 = vmul.f32 %v2309_v34, %v2581_v11 }
 0x24e   : > { %v1892_v49 = vpop.eup %1891 }
 0x24f   : > { %v703_v32 = vmul.f32 %v1890_v44, %v702_v17  ;;  %v729_v27 = vmul.f32 %v1892_v49, %v693_v1  ;;  %1014 = vrot.lane.b32.xlu0 %v992_v51, %s2140_s29  ;;  %vm735_vm14 = vweird.f32 %v1892_v49  ;;  %v3096_v1 = vunpack.i.h.bf16 %v2353_v0 }
 0x250   : > { %vm736_vm0 = vmor %vm734_vm15, %vm735_vm14 }
 0x251   : > { %v707_v39 = vsel %vm706_vm13, %v1890_v44, %v703_v32  ;;  %v730_v48 = vmul.f32 %v1892_v49, %v729_v27 }
 0x252   : > { %v2589_v57 = vmul.f32 %v707_v39, %v2387_v54 }
 0x253   : > { %v731_v40 = vmul.f32 0.5, %v730_v48 }
 0x254   : > { %v656_v22 = vpop.xlane.xlu1 %655  ;;  %v986_v56 = vmul.f32 %v3101_v43, %v2589_v57  ;;  %v1066_v52 = vmul.f32 %v2291_v15, %v2589_v57 }
 0x255   : > { %v732_v53 = vsub.f32 1.5, %v731_v40  ;;  %v683_v51 = vmul.f32 %v2511_v19, %v656_v22 }
 0x257   : > { %1094 = vrot.lane.b32.xlu1 %v1072_v21, %s3116_s28  ;;  %1002 = vrot.lane.b32.xlu0 %v986_v56, %s2140_s29  ;;  %v733_v44 = vmul.f32 %v1892_v49, %v732_v53  ;;  %v2608_v27 = vadd.f32 1.1920929e-07, %v683_v51 }
 0x259   : > { %v737_v2 = vsel %vm736_vm0, %v1892_v49, %v733_v44  ;;  %vm714_vm0 = vweird.f32 %v2608_v27 }
 0x25a   : > { %v2605_v32 = vmul.f32 %v737_v2, %v2398_v59 }
 0x25c   : > { %v659_v63 = vpop.xlane.xlu2 %658  ;;  %v668_v54 = vpop.xlane.xlu1 %667  ;;  %3130 = vst [vmem:[#allocation20_spill] sm:$0xff] %v2605_v32  ;;  %v989_v49 = vmul.f32 %v3096_v1, %v2605_v32  ;;  %v3102_v1 = vunpack.i.l.bf16 %v2353_v0 }
 0x25d   : > { %v684_v16 = vmul.f32 %v2511_v19, %v659_v63  ;;  %v687_v46 = vmul.f32 %v2511_v19, %v668_v54 }
 0x25f   : > { %v692_v47 = vadd.f32 1.1920929e-07, %v684_v16  ;;  %v695_v17 = vadd.f32 1.1920929e-07, %v687_v46  ;;  %1082 = vrot.lane.b32.xlu0 %v1066_v52, %s3116_s28  ;;  %v1069_v52 = vmul.f32 %v2300_v26, %v2605_v32 }
 0x261   : > { %1893 = vrsqrt.f32 %v692_v47  ;;  %vm724_vm3 = vweird.f32 %v692_v47  ;;  %vm754_vm7 = vweird.f32 %v695_v17 }
 0x262   : > { %1895 = vrsqrt.f32 %v695_v17 }
 0x263   : > { %1897 = vrsqrt.f32 %v2608_v27 }
 0x264   : > { %v665_v39 = vpop.xlane.xlu2 %664 }
 0x265   : > { %v686_v48 = vmul.f32 %v2511_v19, %v665_v39 }
 0x267   : > { %v1894_v40 = vpop.eup %1893  ;;  %v694_v56 = vadd.f32 1.1920929e-07, %v686_v48  ;;  %1008 = vrot.lane.b32.xlu0 %v989_v49, %s2140_s29 }
 0x268   : > { %v1896_v22 = vpop.eup %1895  ;;  %v719_v59 = vmul.f32 %v1894_v40, %v692_v47  ;;  %vm725_vm1 = vweird.f32 %v1894_v40 }
 0x269   : > { %v749_v21 = vmul.f32 %v1896_v22, %v695_v17  ;;  %1899 = vrsqrt.f32 %v694_v56  ;;  %v2619_v2 = vpop.eup %1897  ;;  %vm755_vm2 = vweird.f32 %v1896_v22  ;;  %vm726_vm4 = vmor %vm724_vm3, %vm725_vm1  ;;  %vm744_vm10 = vweird.f32 %v694_v56 }
 0x26a   : > { %v720_v53 = vmul.f32 %v1894_v40, %v719_v59  ;;  %vm756_vm8 = vmor %vm754_vm7, %vm755_vm2  ;;  %vm715_vm15 = vweird.f32 %v2619_v2 }
 0x26b   : > { %v750_v44 = vmul.f32 %v1896_v22, %v749_v21  ;;  %vm716_vm1 = vmor %vm714_vm0, %vm715_vm15 }
 0x26c   : > { %v721_v63 = vmul.f32 0.5, %v720_v53  ;;  %v674_v54 = vpop.xlane.xlu2 %673 }
 0x26d   : > { %v751_v16 = vmul.f32 0.5, %v750_v44  ;;  %v689_v46 = vmul.f32 %v2511_v19, %v674_v54  ;;  %v709_v44 = vmul.f32 %v2619_v2, %v2608_v27 }
 0x26e   : > { %v722_v51 = vsub.f32 1.5, %v721_v63 }
 0x26f   : > { %v1900_v39 = vpop.eup %1899  ;;  %v752_v48 = vsub.f32 1.5, %v751_v16  ;;  %v697_v49 = vadd.f32 1.1920929e-07, %v689_v46  ;;  %1088 = vrot.lane.b32.xlu0 %v1069_v52, %s3116_s28 }
 0x270   : > { %v723_v59 = vmul.f32 %v1894_v40, %v722_v51  ;;  %v739_v21 = vmul.f32 %v1900_v39, %v694_v56  ;;  %v710_v51 = vmul.f32 %v2619_v2, %v709_v44  ;;  %vm745_vm9 = vweird.f32 %v1900_v39 }
 0x271   : > { %v753_v53 = vmul.f32 %v1896_v22, %v752_v48  ;;  %1901 = vrsqrt.f32 %v697_v49  ;;  %vm746_vm11 = vmor %vm744_vm10, %vm745_vm9  ;;  %vm774_vm13 = vweird.f32 %v697_v49 }
 0x272   : > { %v727_v54 = vsel %vm726_vm4, %v1894_v40, %v723_v59  ;;  %v740_v63 = vmul.f32 %v1900_v39, %v739_v21 }
 0x273   : > { %v2626_v16 = vmul.f32 %v727_v54, %v2391_v55  ;;  %v757_v46 = vsel %vm756_vm8, %v1896_v22, %v753_v53  ;;  %v3100_v54 = vunpack.i.l.bf16 %v2355_v5 }
 0x274   : > { %v2629_v52 = vmul.f32 %v757_v46, %v2418_v14  ;;  %v741_v47 = vmul.f32 0.5, %v740_v63  ;;  %v711_v14 = vmul.f32 0.5, %v710_v51 }
 0x275   : > { %v988_v17 = vmul.f32 %v3102_v1, %v2626_v16  ;;  %v1068_v46 = vmul.f32 %v2298_v25, %v2626_v16 }
 0x276   : > { %v742_v48 = vsub.f32 1.5, %v741_v47  ;;  %v1071_v40 = vmul.f32 %v2313_v36, %v2629_v52  ;;  %v712_v47 = vsub.f32 1.5, %v711_v14 }
 0x277   : > { %v1902_v59 = vpop.eup %1901  ;;  %1006 = vrot.lane.b32.xlu2 %v988_v17, %s2140_s29 }
 0x278   : > { %v743_v55 = vmul.f32 %v1900_v39, %v742_v48  ;;  %v769_v22 = vmul.f32 %v1902_v59, %v697_v49  ;;  %1092 = vrot.lane.b32.xlu0 %v1071_v40, %s3116_s28  ;;  %vm775_vm12 = vweird.f32 %v1902_v59  ;;  %v3099_v48 = vunpack.i.h.bf16 %v2424_v18 }
 0x279   : > { %vm776_vm14 = vmor %vm774_vm13, %vm775_vm12 }
 0x27a   : > { %v747_v21 = vsel %vm746_vm11, %v1900_v39, %v743_v55  ;;  %v770_v53 = vmul.f32 %v1902_v59, %v769_v22 }
 0x27b   : > { %v2641_v44 = vmul.f32 %v747_v21, %v2409_v8  ;;  %v713_v8 = vmul.f32 %v2619_v2, %v712_v47 }
 0x27c   : > { %v771_v63 = vmul.f32 0.5, %v770_v53 }
 0x27d   : > { %v990_v56 = vmul.f32 %v3100_v54, %v2641_v44  ;;  %v1070_v55 = vmul.f32 %v2304_v30, %v2641_v44  ;;  %v717_v22 = vsel %vm716_vm1, %v2619_v2, %v713_v8  ;;  %v3097_v2 = vunpack.i.h.bf16 %v2355_v5 }
 0x27e   : > { %v772_v17 = vsub.f32 1.5, %v771_v63 }
 0x27f   : > { %1086 = vrot.lane.b32.xlu2 %v1068_v46, %s3116_s28  ;;  %1010 = vrot.lane.b32.xlu1 %v990_v56, %s2140_s29 }
 0x280   : > { %v773_v39 = vmul.f32 %v1902_v59, %v772_v17 }
 0x282   : > { %v777_v51 = vsel %vm776_vm14, %v1902_v59, %v773_v39  ;;  %v2666_v59 = vmul.f32 %v717_v22, %v2406_v4  ;;  %v991_v4 = vmul.f32 %v3097_v2, %v2629_v52 }
 0x283   : > { %v2654_v40 = vmul.f32 %v777_v51, %v2435_v28  ;;  %v3098_v28 = vunpack.i.h.bf16 %v2411_v9 }
 0x284   : > { %3131 = vst [vmem:[#allocation21_spill] sm:$0xff] %v2666_v59  ;;  %v1067_v21 = vmul.f32 %v2296_v20, %v2666_v59 }
 0x285   : > { %v993_v49 = vmul.f32 %v3099_v48, %v2654_v40  ;;  %v1073_v27 = vmul.f32 %v2311_v35, %v2654_v40  ;;  %v987_v14 = vmul.f32 %v3098_v28, %v2666_v59 }
 0x287   : > { %1090 = vrot.lane.b32.xlu2 %v1070_v55, %s3116_s28  ;;  %1016 = vrot.lane.b32.xlu1 %v993_v49, %s2140_s29 }
 0x28f   : > { %1096 = vrot.lane.b32.xlu2 %v1073_v27, %s3116_s28  ;;  %1004 = vrot.lane.b32.xlu1 %v987_v14, %s2140_s29 }
 0x297   : > { %1012 = vrot.lane.b32.xlu2 %v991_v4, %s2140_s29  ;;  %1084 = vrot.lane.b32.xlu1 %v1067_v21, %s3116_s28 }
 0x29e   : > { %v808_v53 = vpop.xlane.xlu0 %807 }
 0x29f   : > { %v822_v63 = vmul.f32 %v808_v53, %v2511_v19 }
 0x2a1   : > { %v2685_v46 = vadd.f32 1.1920929e-07, %v822_v63  ;;  %v814_v56 = vpop.xlane.xlu1 %813 }
 0x2a2   : > { %v824_v47 = vmul.f32 %v814_v56, %v2511_v19 }
 0x2a3   : > { %1903 = vrsqrt.f32 %v2685_v46  ;;  %vm880_vm1 = vweird.f32 %v2685_v46 }
 0x2a4   : > { %v832_v17 = vadd.f32 1.1920929e-07, %v824_v47  ;;  %v802_v39 = vpop.xlane.xlu2 %801 }
 0x2a5   : > { %v820_v8 = vmul.f32 %v802_v39, %v2511_v19 }
 0x2a6   : > { %1905 = vrsqrt.f32 %v832_v17  ;;  %v817_v51 = vpop.xlane.xlu0 %816  ;;  %vm900_vm3 = vweird.f32 %v832_v17 }
 0x2a7   : > { %v828_v55 = vadd.f32 1.1920929e-07, %v820_v8  ;;  %v825_v49 = vmul.f32 %v817_v51, %v2511_v19 }
 0x2a9   : > { %1907 = vrsqrt.f32 %v828_v55  ;;  %v833_v22 = vadd.f32 1.1920929e-07, %v825_v49  ;;  %v796_v27 = vpop.xlane.xlu1 %795  ;;  %v2692_v4 = vpop.eup %1903  ;;  %vm860_vm4 = vweird.f32 %v828_v55 }
 0x2aa   : > { %v818_v14 = vmul.f32 %v796_v27, %v2511_v19  ;;  %v875_v47 = vmul.f32 %v2692_v4, %v2685_v46  ;;  %vm881_vm0 = vweird.f32 %v2692_v4  ;;  %v3134_v46 = vunpack.i.l.bf16 %v2411_v9 }
 0x2ab   : > { %1909 = vrsqrt.f32 %v833_v22  ;;  %vm910_vm11 = vweird.f32 %v833_v22 }
 0x2ac   : > { %v1906_v21 = vpop.eup %1905  ;;  %v2694_v53 = vadd.f32 1.1920929e-07, %v818_v14  ;;  %v811_v63 = vpop.xlane.xlu2 %810  ;;  %v876_v43 = vmul.f32 %v2692_v4, %v875_v47 }
 0x2ad   : > { %v895_v56 = vmul.f32 %v1906_v21, %v832_v17  ;;  %v823_v49 = vmul.f32 %v811_v63, %v2511_v19  ;;  %vm901_vm2 = vweird.f32 %v1906_v21 }
 0x2ae   : > { %1911 = vrsqrt.f32 %v2694_v53  ;;  %v799_v39 = vpop.xlane.xlu0 %798  ;;  %vm902_vm7 = vmor %vm900_vm3, %vm901_vm2  ;;  %vm840_vm14 = vweird.f32 %v2694_v53 }
 0x2af   : > { %v1908_v8 = vpop.eup %1907  ;;  %v896_v51 = vmul.f32 %v1906_v21, %v895_v56  ;;  %v819_v27 = vmul.f32 %v799_v39, %v2511_v19  ;;  %v2704_v59 = vadd.f32 1.1920929e-07, %v823_v49  ;;  %vm882_vm2 = vmor %vm880_vm1, %vm881_vm0 }
 0x2b0   : > { %v855_v2 = vmul.f32 %v1908_v8, %v828_v55  ;;  %vm861_vm8 = vweird.f32 %v1908_v8 }
 0x2b1   : > { %v1910_v28 = vpop.eup %1909  ;;  %v897_v48 = vmul.f32 0.5, %v896_v51  ;;  %v2701_v54 = vadd.f32 1.1920929e-07, %v819_v27  ;;  %v805_v14 = vpop.xlane.xlu1 %804  ;;  %vm862_vm10 = vmor %vm860_vm4, %vm861_vm8 }
 0x2b2   : > { %v856_v1 = vmul.f32 %v1908_v8, %v855_v2  ;;  %v905_v12 = vmul.f32 %v1910_v28, %v833_v22  ;;  %v821_v63 = vmul.f32 %v805_v14, %v2511_v19  ;;  %vm911_vm9 = vweird.f32 %v1910_v28 }
 0x2b3   : > { %v898_v31 = vsub.f32 1.5, %v897_v48  ;;  %1913 = vrsqrt.f32 %v2701_v54  ;;  %v877_v48 = vmul.f32 0.5, %v876_v43  ;;  %vm912_vm12 = vmor %vm910_vm11, %vm911_vm9  ;;  %vm850_vm9 = vweird.f32 %v2701_v54 }
 0x2b4   : > { %v1912_v56 = vpop.eup %1911  ;;  %v857_v39 = vmul.f32 0.5, %v856_v1  ;;  %v906_v32 = vmul.f32 %v1910_v28, %v905_v12  ;;  %v2709_v27 = vadd.f32 1.1920929e-07, %v821_v63  ;;  %1915 = vrsqrt.f32 %v2704_v59 }
 0x2b5   : > { %v899_v13 = vmul.f32 %v1906_v21, %v898_v31  ;;  %v835_v51 = vmul.f32 %v1912_v56, %v2694_v53  ;;  %vm841_vm13 = vweird.f32 %v1912_v56  ;;  %v878_v55 = vsub.f32 1.5, %v877_v48 }
 0x2b6   : > { %v858_v47 = vsub.f32 1.5, %v857_v39  ;;  %v907_v2 = vmul.f32 0.5, %v906_v32  ;;  %1917 = vrsqrt.f32 %v2709_v27  ;;  %vm842_vm15 = vmor %vm840_vm14, %vm841_vm13  ;;  %vm870_vm4 = vweird.f32 %v2709_v27 }
 0x2b7   : > { %v903_v49 = vsel %vm902_vm7, %v1906_v21, %v899_v13  ;;  %v836_v61 = vmul.f32 %v1912_v56, %v835_v51  ;;  %vm1114_vm14 = vcmask 31744  }
 0x2b8   : > { %v2713_v19 = vmul.f32 %v903_v49, %v2463_v37  ;;  %v859_v12 = vmul.f32 %v1908_v8, %v858_v47  ;;  %v908_v31 = vsub.f32 1.5, %v907_v2  ;;  %v1870_v47 = vunpack.i.h.bf16 %v2440_v33 }
 0x2b9   : > { %v2715_v1 = vpop.eup %1913  ;;  %v837_v17 = vmul.f32 0.5, %v836_v61  ;;  %v3132_v61 = vunpack.i.l.bf16 %v2424_v18 }
 0x2ba   : > { %v863_v32 = vsel %vm862_vm10, %v1908_v8, %v859_v12  ;;  %v909_v14 = vmul.f32 %v1910_v28, %v908_v31  ;;  %v845_v13 = vmul.f32 %v2715_v1, %v2701_v54  ;;  %v1201_v21 = vmul.f32 %v2309_v34, %v2713_v19  ;;  %v2729_v39 = vpop.eup %1915 }
 0x2bb   : > { %v2722_v43 = vmul.f32 %v863_v32, %v2475_v3  ;;  %v838_v37 = vsub.f32 1.5, %v837_v17  ;;  %v1145_v8 = vmul.f32 %v3132_v61, %v2713_v19  ;;  %vm851_vm8 = vweird.f32 %v2715_v1 }
 0x2bc   : > { %v913_v63 = vsel %vm912_vm12, %v1910_v28, %v909_v14  ;;  %1223 = vrot.lane.b32.xlu0 %v1201_v21, %s3116_s28  ;;  %v846_v34 = vmul.f32 %v2715_v1, %v845_v13  ;;  %v1918_v28 = vpop.eup %1917  ;;  %vm852_vm10 = vmor %vm850_vm9, %vm851_vm8  ;;  %vm891_vm11 = vweird.f32 %v2729_v39  ;;  %vm890_vm12 = vweird.f32 %v2704_v59 }
 0x2bd   : > { %v2732_v22 = vmul.f32 %v913_v63, %v2492_v42  ;;  %v839_v51 = vmul.f32 %v1912_v56, %v838_v37  ;;  %v1197_v3 = vmul.f32 %v2298_v25, %v2722_v43  ;;  %1167 = vrot.lane.b32.xlu2 %v1145_v8, %s2140_s29  ;;  %v879_v42 = vmul.f32 %v2692_v4, %v878_v55  ;;  %vm892_vm13 = vmor %vm890_vm12, %vm891_vm11 }
 0x2be   : > { %v865_v25 = vmul.f32 %v1918_v28, %v2709_v27  ;;  %v847_v12 = vmul.f32 0.5, %v846_v34  ;;  %vm871_vm3 = vweird.f32 %v1918_v28 }
 0x2bf   : > { %v843_v2 = vsel %vm842_vm15, %v1912_v56, %v839_v51  ;;  %1215 = vrot.lane.b32.xlu1 %v1197_v3, %s3116_s28  ;;  %v2753_v49 = vmul.f32 %v1870_v47, %v2732_v22  ;;  %v885_v56 = vmul.f32 %v2729_v39, %v2704_v59  ;;  %v883_v14 = vsel %vm882_vm2, %v2692_v4, %v879_v42  ;;  %vm872_vm7 = vmor %vm870_vm4, %vm871_vm3 }
 0x2c0   : > { %v2745_v53 = vmul.f32 %v843_v2, %v2469_v62  ;;  %v866_v31 = vmul.f32 %v1918_v28, %v865_v25  ;;  %v3133_v62 = vunpack.i.l.bf16 %v2353_v0  ;;  %v848_v55 = vsub.f32 1.5, %v847_v12 }
 0x2c1   : > { %v2748_v48 = vpop.permute.xlu0 %1014  ;;  %v886_v21 = vmul.f32 %v2729_v39, %v885_v56  ;;  %v2771_v61 = vmul.f32 %v883_v14, %v2456_v29  ;;  %v3135_v29 = vunpack.i.l.bf16 %v2355_v5  ;;  %v1202_v42 = vmul.f32 %v2311_v35, %v2732_v22 }
 0x2c2   : > { %v1141_v17 = vmul.f32 %v3133_v62, %v2722_v43  ;;  %v1195_v32 = vmul.f32 %v2291_v15, %v2745_v53  ;;  %v867_v13 = vmul.f32 0.5, %v866_v31  ;;  %v1139_v37 = vmul.f32 %v3134_v46, %v2745_v53 }
 0x2c3   : > { %v887_v4 = vmul.f32 0.5, %v886_v21  ;;  %v849_v8 = vmul.f32 %v2715_v1, %v848_v55  ;;  %v1143_v2 = vmul.f32 %v3135_v29, %v2771_v61  ;;  %v1854_v35 = vunpack.i.l.bf16 %v2431_v24 }
 0x2c4   : > { %1159 = vrot.lane.b32.xlu0 %v1141_v17, %s2140_s29  ;;  %v868_v63 = vsub.f32 1.5, %v867_v13  ;;  %v3137_v31 = vunpack.i.h.bf16 %v2411_v9  ;;  %v3138_v62 = vunpack.i.h.bf16 %v2353_v0  ;;  %v938_v9 = vmul.f32 %v2332_v50, %v2589_v57 }
 0x2c5   : > { %1211 = vrot.lane.b32.xlu2 %v1195_v32, %s3116_s28  ;;  %v1859_v32 = vunpack.i.l.bf16 %v2359_v7  ;;  %v1058_v59 = vmul.f32 %v1854_v35, %v2589_v57  ;;  %v940_v14 = vmul.f32 %v2325_v45, %v2626_v16 }
 0x2c6   : > { %v869_v15 = vmul.f32 %v1918_v28, %v868_v63 }
 0x2c7   : > { %1155 = vrot.lane.b32.xlu1 %v1139_v37, %s2140_s29  ;;  %v1060_v13 = vmul.f32 %v1859_v32, %v2626_v16 }
 0x2c8   : > { %v873_v51 = vsel %vm872_vm7, %v1918_v28, %v869_v15  ;;  %v888_v28 = vsub.f32 1.5, %v887_v4 }
 0x2c9   : > { %v2778_v3 = vmul.f32 %v873_v51, %v2529_v10  ;;  %v1003_v34 = vpop.permute.xlu0 %1002  ;;  %v853_v10 = vsel %vm852_vm10, %v2715_v1, %v849_v8 }
 0x2ca   : > { %v2793_v25 = vmul.f32 %v853_v10, %v2517_v23  ;;  %v889_v56 = vmul.f32 %v2729_v39, %v888_v28  ;;  %v1026_v37 = vadd.f32 %v1003_v34, %v938_v9  ;;  %v944_v28 = vmul.f32 %v2343_v60, %v2581_v11 }
 0x2cb   : > { %v1198_v27 = vmul.f32 %v2300_v26, %v2778_v3  ;;  %v3136_v26 = vunpack.i.h.bf16 %v2424_v18  ;;  %v1142_v17 = vmul.f32 %v3138_v62, %v2778_v3 }
 0x2cc   : > { %1163 = vrot.lane.b32.xlu0 %v1143_v2, %s2140_s29  ;;  %v1140_v23 = vmul.f32 %v3137_v31, %v2793_v25  ;;  %v893_v18 = vsel %vm892_vm13, %v2729_v39, %v889_v56  ;;  %v1196_v63 = vmul.f32 %v2296_v20, %v2793_v25  ;;  %v1032_v56 = vadd.f32 %v2748_v48, %v944_v28 }
 0x2cd   : > { %1217 = vrot.lane.b32.xlu2 %v1198_v27, %s3116_s28  ;;  %v1146_v12 = vmul.f32 %v3136_v26, %v2732_v22  ;;  %v2824_v39 = vmul.f32 %v893_v18, %v2480_v58  ;;  %v3139_v58 = vunpack.i.h.bf16 %v2355_v5  ;;  %v1869_v27 = vunpack.i.l.bf16 %v2440_v33 }
 0x2ce   : > { %v942_v31 = vmul.f32 %v2316_v38, %v2641_v44 }
 0x2cf   : > { %1225 = vrot.lane.b32.xlu1 %v1202_v42, %s3116_s28  ;;  %v1200_v8 = vmul.f32 %v2313_v36, %v2824_v39  ;;  %v1144_v16 = vmul.f32 %v3139_v58, %v2824_v39  ;;  %v1199_v36 = vmul.f32 %v2304_v30, %v2771_v61  ;;  %v1095_v42 = vpop.permute.xlu1 %1094  ;;  %v1064_v5 = vmul.f32 %v1869_v27, %v2581_v11 }
 0x2d1   : > { %v1007_v54 = vpop.permute.xlu2 %1006  ;;  %v1083_v1 = vpop.permute.xlu0 %1082  ;;  %v1112_v10 = vsub.f32 %v1064_v5, %v1095_v42 }
 0x2d2   : > { %v1106_v0 = vsub.f32 %v1058_v59, %v1083_v1  ;;  %v1028_v21 = vadd.f32 %v1007_v54, %v940_v14  ;;  %v1865_v14 = vunpack.i.h.bf16 %v2357_v6 }
 0x2d3   : > { %v1121_v30 = vsel %vm1114_vm14, %v1032_v56, %v1112_v10  ;;  %v3143_v10 = vld [vmem:[#allocation15_spill] sm:$0xff] }
 0x2d4   : > { %1169 = vrot.lane.b32.xlu0 %v1146_v12, %s2140_s29  ;;  %v1115_v57 = vsel %vm1114_vm14, %v1026_v37, %v1106_v0  ;;  %v1864_v12 = vunpack.i.l.bf16 %v2357_v6  ;;  %v943_v0 = vmul.f32 %v2320_v41, %v2629_v52  ;;  %v1063_v37 = vmul.f32 %v1865_v14, %v2629_v52  ;;  %v3142_v52 = vld [vmem:[#allocation20_spill] sm:$0xff] }
 0x2d5   : > { %1157 = vrot.lane.b32.xlu2 %v1140_v23, %s2140_s29  ;;  %v1123_v51 = vmul.f32 0.35355338, %v1115_v57  ;;  %v1129_v23 = vmul.f32 0.35355338, %v1121_v30 }
 0x2d6   : > { %v1062_v1 = vmul.f32 %v1864_v12, %v2641_v44  ;;  %v1065_v44 = vmul.f32 %v1870_v47, %v2654_v40  ;;  %v3141_v47 = vld [vmem:[#allocation18_spill] sm:$0xff] }
 0x2d7   : > { %1161 = vrot.lane.b32.xlu1 %v1142_v17, %s2140_s29  ;;  %v1263_v59 = vrot.slane %v1129_v23, 4 }
 0x2d9   : > { %v1087_v46 = vpop.permute.xlu2 %1086  ;;  %v1009_v2 = vpop.permute.xlu0 %1008 }
 0x2da   : > { %v1108_v55 = vsub.f32 %v1060_v13, %v1087_v46 }
 0x2dc   : > { %v1117_v15 = vsel %vm1114_vm14, %v1028_v21, %v1108_v55  ;;  %1213 = vrot.lane.b32.xlu0 %v1196_v63, %s3116_s28  ;;  %v3140_v55 = vld [vmem:[#allocation17_spill] sm:$0xff] }
 0x2dd   : > { %v1125_v4 = vmul.f32 0.35355338, %v1117_v15  ;;  %1221 = vrot.lane.b32.xlu2 %v1200_v8, %s3116_s28  ;;  %v945_v63 = vmul.f32 %v3140_v55, %v2654_v40 }
 0x2df   : > { %v1251_v34 = vrot.slane %v1125_v4, 4  ;;  %1165 = vrot.lane.b32.xlu1 %v1144_v16, %s2140_s29  ;;  %s1995_s29 = scalar_lea.hbm %s1994_s17, 16 }
 0x2e0   : > { %p1996_p1 = scmp.ne.s32.totalorder %s1994_s17, %s1995_s29  ;;  %p2001_p11 = scmp.lt.s32.totalorder %s1999_s16, %s1995_s29 }
 0x2e1   : > { %v2839_v20 = vsel %vm450_vm5, %v1251_v34, %v1123_v51  ;;  %v1091_v29 = vpop.permute.xlu2 %1090  ;;  %v1089_v26 = vpop.permute.xlu0 %1088  ;;  %v1860_v34 = vunpack.i.h.bf16 %v2359_v7 }
 0x2e2   : > { %v1110_v17 = vsub.f32 %v1062_v1, %v1091_v29  ;;  %p1997_p3 = pnand %p1996_p1, %p2249_p4  ;;  %p2002_p12 = por %p2001_p11, %p2000_p10 }
 0x2e3   : > { %v1061_v5 = vmul.f32 %v1860_v34, %v3142_v52 }
 0x2e4   : > { %p1998_p9 = pneg %p1997_p3 }
 0x2e5   : > { %v1109_v56 = vsub.f32 %v1061_v5, %v1089_v26 }
 0x2e6   : > { %p2003_p13 = pnand %p2002_p12, %p1998_p9 }
 0x2e7   : > { %1219 = vrot.lane.b32.xlu1 %v1199_v36, %s3116_s28 }
 0x2e9   : > { %v1097_v54 = vpop.permute.xlu2 %1096 }
 0x2ea   : > { %v1093_v13 = vpop.permute.xlu0 %1092  ;;  %v1113_v15 = vsub.f32 %v1065_v44, %v1097_v54  ;;  %v941_v54 = vmul.f32 %v3143_v10, %v3142_v52  ;;  %v1256_v44 = vperm.slane %v2839_v20, %v3141_v47 }
 0x2eb   : > { %v1111_v4 = vsub.f32 %v1063_v37, %v1093_v13 }
 0x2f1   : > { %v1011_v62 = vpop.permute.xlu1 %1010  ;;  %v1013_v48 = vpop.permute.xlu2 %1012 }
 0x2f2   : > { %v1030_v11 = vadd.f32 %v1011_v62, %v942_v31  ;;  %v1031_v21 = vadd.f32 %v1013_v48, %v943_v0  ;;  %v1029_v31 = vadd.f32 %v1009_v2, %v941_v54  ;;  %v3145_v48 = vld [vmem:[#allocation16_spill] sm:$0xff] }
 0x2f4   : > { %v1119_v18 = vsel %vm1114_vm14, %v1030_v11, %v1110_v17  ;;  %v1120_v58 = vsel %vm1114_vm14, %v1031_v21, %v1111_v4  ;;  %v1855_v17 = vunpack.i.h.bf16 %v2431_v24  ;;  %v1118_v11 = vsel %vm1114_vm14, %v1029_v31, %v1109_v56 }
 0x2f5   : > { %v1127_v9 = vmul.f32 0.35355338, %v1119_v18  ;;  %v1128_v36 = vmul.f32 0.35355338, %v1120_v58  ;;  %v1126_v0 = vmul.f32 0.35355338, %v1118_v11 }
 0x2f7   : > { %v1264_v46 = vsel %vm450_vm5, %v1263_v59, %v1127_v9  ;;  %v3144_v59 = vld [vmem:[#allocation21_spill] sm:$0xff]  ;;  %v1257_v21 = vrot.slane %v1126_v0, 4 }
 0x2f8   : > { %v1268_v29 = vperm.slane %v1264_v46, %v3141_v47  ;;  %v939_v9 = vmul.f32 %v3145_v48, %v3144_v59  ;;  %v1059_v26 = vmul.f32 %v1855_v17, %v3144_v59 }
 0x2f9   : > { %v1017_v57 = vpop.permute.xlu1 %1016 }
 0x2fa   : > { %v1033_v8 = vadd.f32 %v1017_v57, %v945_v63  ;;  %v1289_v30 = vrot.slane %v1268_v29, 4  ;;  %v3146_v57 = vld [vmem:[#allocation19_spill] sm:$0xff] }
 0x2fc   : > { %v1122_v16 = vsel %vm1114_vm14, %v1033_v8, %v1113_v15  ;;  %v1277_v8 = vrot.slane %v1256_v44, 4 }
 0x2fd   : > { %v1130_v51 = vmul.f32 0.35355338, %v1122_v16 }
 0x2ff   : > { %v1269_v42 = vrot.slane %v1130_v51, 4 }
 0x301   : > { %v1270_v40 = vsel %vm450_vm5, %v1269_v42, %v1128_v36  ;;  %v1005_v28 = vpop.permute.xlu1 %1004 }
 0x302   : > { %v1274_v1 = vperm.slane %v1270_v40, %v3141_v47  ;;  %v1027_v2 = vadd.f32 %v1005_v28, %v939_v9 }
 0x304   : > { %v1287_v23 = vrot.slane %v1274_v1, 4  ;;  %v1290_v62 = vsel %vm450_vm5, %v1274_v1, %v1289_v30 }
 0x305   : > { %v1298_v15 = vperm.slane %v1290_v62, %v3146_v57 }
 0x306   : > { %v1288_v18 = vsel %vm450_vm5, %v1287_v23, %v1268_v29 }
 0x307   : > { %v1294_v16 = vperm.slane %v1288_v18, %v3146_v57  ;;  %v1303_v29 = vrot.slane %v1298_v15, 4 }
 0x309   : > { %v1085_v13 = vpop.permute.xlu1 %1084  ;;  %v1299_v52 = vrot.slane %v1294_v16, 4 }
 0x30a   : > { %v1107_v46 = vsub.f32 %v1059_v26, %v1085_v13 }
 0x30c   : > { %v1116_v37 = vsel %vm1114_vm14, %v1027_v2, %v1107_v46 }
 0x30d   : > { %v1124_v63 = vmul.f32 0.35355338, %v1116_v37 }
 0x30f   : > { %v1258_v4 = vsel %vm450_vm5, %v1257_v21, %v1124_v63 }
 0x310   : > { %v1262_v58 = vperm.slane %v1258_v4, %v3141_v47 }
 0x312   : > { %v1275_v51 = vrot.slane %v1262_v58, 4  ;;  %v1278_v20 = vsel %vm450_vm5, %v1262_v58, %v1277_v8 }
 0x313   : > { %v1286_v36 = vperm.slane %v1278_v20, %v3146_v57 }
 0x314   : > { %v1276_v42 = vsel %vm450_vm5, %v1275_v51, %v1256_v44 }
 0x315   : > { %v1282_v5 = vperm.slane %v1276_v42, %v3146_v57  ;;  %v1304_v40 = vsel %vm450_vm5, %v1303_v29, %v1286_v36  ;;  %v1305_v28 = vrot.slane %v1286_v36, 4 }
 0x316   : > { %v1309_v54 = vpack.c.bf16 %v1304_v40, %v1304_v40 }
 0x317   : > { %v1300_v56 = vsel %vm450_vm5, %v1299_v52, %v1282_v5  ;;  %v1301_v30 = vrot.slane %v1282_v5, 4  ;;  %v1306_v1 = vsel %vm450_vm5, %v1298_v15, %v1305_v28 }
 0x318   : > { %v1307_v31 = vpack.c.bf16 %v1300_v56, %v1300_v56  ;;  %v1310_v23 = vpack.c.bf16 %v1306_v1, %v1306_v1  ;;  %1313 = vst.msk [vmem:[%s336_s24 + $0x8] sm:$0xf] %vm650_vm6, %v1309_v54 }
 0x319   : > { %v1302_v62 = vsel %vm450_vm5, %v1294_v16, %v1301_v30 }
 0x31a   : > { %v1308_v11 = vpack.c.bf16 %v1302_v62, %v1302_v62  ;;  %1311 = vst.msk [vmem:[%s336_s24] sm:$0xf] %vm650_vm6, %v1307_v31 }
 0x31b   : > { %1314 = vst.msk [vmem:[%s336_s24 + $0xc] sm:$0xf] %vm650_vm6, %v1310_v23 }
 0x31c   : > { %1312 = vst.msk [vmem:[%s336_s24 + $0x4] sm:$0xf] %vm650_vm6, %v1308_v11 }
 0x31d   : > { %2006 = shalt.err (!%p2003_p13)
}
 0x31e   : > { %s3147_s3 = smov 4   ;;  %s3148_s24 = smov 64   ;;  %v1168_v18 = vpop.permute.xlu2 %1167  ;;  %v1189_v0 = vmul.f32 %v1859_v32, %v2722_v43  ;;  %v1133_v13 = vmul.f32 %v2325_v45, %v2722_v43  ;;  %v1187_v46 = vmul.f32 %v1854_v35, %v2745_v53  ;;  %v1131_v21 = vmul.f32 %v2332_v50, %v2745_v53 }
 0x31f   : > { %1741 = dma.vmem_to_hbm [thread:$0]  (%p2249_p4), %s1466_s9, 256, %s1468_s10, %s1442_s11, %s3148_s24, %s3148_s24, %s3147_s3   ;;  %v1138_v35 = vmul.f32 %v3140_v55, %v2732_v22  ;;  %v1134_v36 = vmul.f32 %v3143_v10, %v2778_v3  ;;  %v1190_v52 = vmul.f32 %v1860_v34, %v2778_v3  ;;  %v1132_v54 = vmul.f32 %v3145_v48, %v2793_v25 }
 0x320   : > { %v1192_v55 = vmul.f32 %v1865_v14, %v2824_v39  ;;  %v1136_v30 = vmul.f32 %v2320_v41, %v2824_v39  ;;  %v1193_v24 = vmul.f32 %v1869_v27, %v2713_v19  ;;  %v1137_v14 = vmul.f32 %v2343_v60, %v2713_v19  ;;  %s1482_s9 = scalar_lea.hbm %s3089_s5, %s2899_s7  ;;  %s1500_s17 = scalar_lea.hbm %s3090_s6, %s2899_s7 }
 0x321   : > { %v1135_v60 = vmul.f32 %v2316_v38, %v2771_v61  ;;  %s1446_s29 = sand.u32 1, %s2207_s27   ;;  %s343_s12 = scalar_lea.vmem [#allocation8], %s2555_s8 }
 0x322   : > { %v1185_v33 = vadd.f32 %v1168_v18, %v1137_v14  ;;  %s1483_s15 = sshll.u32 %s343_s12, 4  ;;  %s3010_s16 = sshll.u32 %s1482_s9, 4  ;;  %s1484_s15 = int_to_ptr.vmem [resolvable:$true] %s1483_s15  ;;  %s1486_s16 = int_to_ptr.hbm [resolvable:$true] %s3010_s16 }
 0x323   : > { %s3013_s28 = sshll.u32 %s1500_s17, 4  ;;  %s1501_s7 = sshll.u32 %s2567_s30, 4  ;;  %s3020_s7 = int_to_ptr.vmem [resolvable:$true] %s1501_s7  ;;  %s1504_s28 = int_to_ptr.hbm [resolvable:$true] %s3013_s28 }
 0x324   : > { %s3024_s27 = scalar_lea.sflag [#allocation9], %s1446_s29  ;;  %s2021_s8 = sshra.s32 %s1486_s16, 4  ;;  %s2022_s8 = int_to_ptr.hbm [resolvable:$true] %s2021_s8 }
 0x325   : > { %s2023_s14 = scalar_lea.hbm %s2022_s8, 16  ;;  %s2027_s10 = scalar_lea.hbm %s3089_s5, 32 }
 0x326   : > { %v1212_v9 = vpop.permute.xlu2 %1211  ;;  %p2024_p0 = scmp.ne.s32.totalorder %s2022_s8, %s2023_s14  ;;  %p2028_p8 = scmp.lt.s32.totalorder %s2022_s8, %s3089_s5 }
 0x327   : > { %v1235_v15 = vsub.f32 %v1187_v46, %v1212_v9  ;;  %p2029_p1 = scmp.lt.s32.totalorder %s2027_s10, %s2023_s14 }
 0x328   : > { %p2025_p2 = pnand %p2024_p0, %p2249_p4 }
 0x329   : > { %p2030_p3 = por %p2029_p1, %p2028_p8 }
 0x32a   : > { %p2026_p5 = pneg %p2025_p2 }
 0x32c   : > { %p2031_p9 = pnand %p2030_p3, %p2026_p5 }
 0x32e   : > { %v1224_v59 = vpop.permute.xlu0 %1223  ;;  %v1218_v58 = vpop.permute.xlu2 %1217 }
 0x32f   : > { %v1238_v28 = vsub.f32 %v1190_v52, %v1218_v58  ;;  %v1241_v11 = vsub.f32 %v1193_v24, %v1224_v59  ;;  %v1191_v59 = vmul.f32 %v1864_v12, %v2771_v61 }
 0x331   : > { %v1216_v26 = vpop.permute.xlu1 %1215 }
 0x332   : > { %v1237_v44 = vsub.f32 %v1189_v0, %v1216_v26 }
 0x336   : > { %v1160_v2 = vpop.permute.xlu0 %1159  ;;  %v1158_v20 = vpop.permute.xlu2 %1157 }
 0x337   : > { %v1181_v37 = vadd.f32 %v1160_v2, %v1133_v13  ;;  %v1180_v3 = vadd.f32 %v1158_v20, %v1132_v54  ;;  %v1249_v13 = vsel %vm1114_vm14, %v1185_v33, %v1241_v11 }
 0x339   : > { %v1156_v63 = vpop.permute.xlu1 %1155  ;;  %v1245_v4 = vsel %vm1114_vm14, %v1181_v37, %v1237_v44  ;;  %v1327_v37 = vrot.slane %v1249_v13, 4 }
 0x33a   : > { %v1179_v8 = vadd.f32 %v1156_v63, %v1131_v21  ;;  %v1315_v32 = vrot.slane %v1245_v4, 4 }
 0x33c   : > { %v1243_v16 = vsel %vm1114_vm14, %v1179_v8, %v1235_v15 }
 0x33d   : > { %v1316_v45 = vsel %vm450_vm5, %v1315_v32, %v1243_v16 }
 0x33e   : > { %v1164_v43 = vpop.permute.xlu0 %1163  ;;  %v1222_v10 = vpop.permute.xlu2 %1221  ;;  %v1320_v34 = vperm.slane %v1316_v45, %v3141_v47 }
 0x33f   : > { %v1183_v46 = vadd.f32 %v1164_v43, %v1135_v60 }
 0x340   : > { %v1341_v9 = vrot.slane %v1320_v34, 4 }
 0x341   : > { %v1226_v51 = vpop.permute.xlu1 %1225 }
 0x342   : > { %v1242_v50 = vsub.f32 %v2753_v49, %v1226_v51  ;;  %v1188_v49 = vmul.f32 %v1855_v17, %v2793_v25  ;;  %v1240_v25 = vsub.f32 %v1192_v55, %v1222_v10 }
 0x346   : > { %v1170_v29 = vpop.permute.xlu0 %1169 }
 0x347   : > { %v1186_v53 = vadd.f32 %v1170_v29, %v1138_v35 }
 0x349   : > { %v1162_v42 = vpop.permute.xlu1 %1161  ;;  %v1250_v5 = vsel %vm1114_vm14, %v1186_v53, %v1242_v50 }
 0x34a   : > { %v1182_v40 = vadd.f32 %v1162_v42, %v1134_v36  ;;  %v1333_v23 = vrot.slane %v1250_v5, 4 }
 0x34c   : > { %v1246_v22 = vsel %vm1114_vm14, %v1182_v40, %v1238_v28 }
 0x34d   : > { %v1321_v48 = vrot.slane %v1246_v22, 4 }
 0x34e   : > { %v1214_v7 = vpop.permute.xlu0 %1213 }
 0x34f   : > { %v1236_v56 = vsub.f32 %v1188_v49, %v1214_v7 }
 0x351   : > { %v1166_v1 = vpop.permute.xlu1 %1165  ;;  %v1244_v17 = vsel %vm1114_vm14, %v1180_v3, %v1236_v56 }
 0x352   : > { %v1184_v31 = vadd.f32 %v1166_v1, %v1136_v30  ;;  %v1322_v62 = vsel %vm450_vm5, %v1321_v48, %v1244_v17 }
 0x353   : > { %v1326_v41 = vperm.slane %v1322_v62, %v3141_v47 }
 0x354   : > { %v1248_v39 = vsel %vm1114_vm14, %v1184_v31, %v1240_v25 }
 0x355   : > { %v1334_v26 = vsel %vm450_vm5, %v1333_v23, %v1248_v39  ;;  %v1339_v27 = vrot.slane %v1326_v41, 4  ;;  %v1342_v0 = vsel %vm450_vm5, %v1326_v41, %v1341_v9 }
 0x356   : > { %v1338_v44 = vperm.slane %v1334_v26, %v3141_v47  ;;  %v1350_v6 = vperm.slane %v1342_v0, %v3146_v57 }
 0x357   : > { %v1340_v19 = vsel %vm450_vm5, %v1339_v27, %v1320_v34 }
 0x358   : > { %v1346_v63 = vperm.slane %v1340_v19, %v3146_v57  ;;  %v1351_v15 = vrot.slane %v1338_v44, 4  ;;  %v1369_v16 = vrot.slane %v1350_v6, 4 }
 0x359   : > { %v1220_v2 = vpop.permute.xlu1 %1219 }
 0x35a   : > { %v1239_v18 = vsub.f32 %v1191_v59, %v1220_v2  ;;  %v1365_v8 = vrot.slane %v1346_v63, 4 }
 0x35c   : > { %v1247_v21 = vsel %vm1114_vm14, %v1183_v46, %v1239_v18 }
 0x35d   : > { %v1328_v38 = vsel %vm450_vm5, %v1327_v37, %v1247_v21 }
 0x35e   : > { %v1332_v4 = vperm.slane %v1328_v38, %v3141_v47 }
 0x360   : > { %v1352_v61 = vsel %vm450_vm5, %v1351_v15, %v1332_v4  ;;  %v1353_v12 = vrot.slane %v1332_v4, 4 }
 0x361   : > { %v1358_v58 = vperm.slane %v1352_v61, %v3146_v57 }
 0x362   : > { %v1354_v32 = vsel %vm450_vm5, %v1338_v44, %v1353_v12 }
 0x363   : > { %v1362_v45 = vperm.slane %v1354_v32, %v3146_v57  ;;  %v1363_v47 = vrot.slane %v1358_v58, 4  ;;  %v1366_v43 = vsel %vm450_vm5, %v1358_v58, %v1365_v8 }
 0x364   : > { %v1372_v51 = vpack.c.bf16 %v1366_v43, %v1366_v43 }
 0x365   : > { %v1364_v20 = vsel %vm450_vm5, %v1363_v47, %v1346_v63  ;;  %v1367_v35 = vrot.slane %v1362_v45, 4  ;;  %v1370_v29 = vsel %vm450_vm5, %v1362_v45, %v1369_v16 }
 0x366   : > { %v1371_v57 = vpack.c.bf16 %v1364_v20, %v1364_v20  ;;  %v1374_v50 = vpack.c.bf16 %v1370_v29, %v1370_v29  ;;  %1376 = vst.msk [vmem:[%s343_s12 + $0x4] sm:$0xf] %vm650_vm6, %v1372_v51 }
 0x367   : > { %v1368_v53 = vsel %vm450_vm5, %v1367_v35, %v1350_v6 }
 0x368   : > { %v1373_v36 = vpack.c.bf16 %v1368_v53, %v1368_v53  ;;  %1375 = vst.msk [vmem:[%s343_s12] sm:$0xf] %vm650_vm6, %v1371_v57 }
 0x369   : > { %1378 = vst.msk [vmem:[%s343_s12 + $0xc] sm:$0xf] %vm650_vm6, %v1374_v50 }
 0x36a   : > { %1377 = vst.msk [vmem:[%s343_s12 + $0x8] sm:$0xf] %vm650_vm6, %v1373_v36 }
 0x36b   : > { %2034 = shalt.err (!%p2031_p9)
}
 0x36c   : > { %1742 = dma.vmem_to_hbm [thread:$0]  (%p2249_p4), %s1484_s15, 256, %s1486_s16, %s3024_s27, %s3148_s24, %s3148_s24, %s3147_s3  }
 0x36d   : > { %s2049_s29 = sshra.s32 %s1504_s28, 4  ;;  %s2055_s30 = scalar_lea.hbm %s3090_s6, 32  ;;  %s2050_s29 = int_to_ptr.hbm [resolvable:$true] %s2049_s29 }
 0x36e   : > { %s2051_s12 = scalar_lea.hbm %s2050_s29, 16  ;;  %p2056_p13 = scmp.lt.s32.totalorder %s2050_s29, %s3090_s6 }
 0x36f   : > { %p2052_p10 = scmp.ne.s32.totalorder %s2050_s29, %s2051_s12  ;;  %p2057_p0 = scmp.lt.s32.totalorder %s2055_s30, %s2051_s12 }
 0x371   : > { %p2053_p11 = pnand %p2052_p10, %p2249_p4  ;;  %p2058_p2 = por %p2057_p0, %p2056_p13 }
 0x373   : > { %p2054_p12 = pneg %p2053_p11 }
 0x375   : > { %p2059_p5 = pnand %p2058_p2, %p2054_p12 }
 0x377   : > { %2062 = shalt.err (!%p2059_p5)
}
 0x378   : > { %1743 = dma.vmem_to_hbm [thread:$0]  (%p2249_p4), %s3020_s7, 256, %s1504_s28, %s3024_s27, %s3148_s24, %s3148_s24, %s3147_s3  }
 0x379 PF: > { %s1518_s15 = sand.u32 1, %s2105_s21   ;;  %p1756_p8 = pnand %p1701_p6, %p2257_p7 }
 0x37a   : > { %s1519_s16 = scalar_lea.sflag [#allocation4], %s1518_s15 }
 0x37b   : > { %p1757_p1 = pneg %p1756_p8 }
 0x37d   : > { %2096 = dma.done.wait (%p1757_p1), %s1519_s16, 256  }
 0x37e   : > { %2098 = vsyncadd (%p1757_p1), %s1519_s16, 4294967040  ;;  %s3149_s18 = sadd.s32 4294967294, %s2125_s26  }
 0x37f   : > { %s1528_s11 = sand.u32 1, %s3149_s18  }
 0x380   : > { %s1529_s17 = scalar_lea.sflag [#allocation9], %s1528_s11 }
 0x381   : > { %2100 = dma.done.wait (%p1757_p1), %s1529_s17, 512  }
 0x382   : > { %2102 = vsyncadd (%p1757_p1), %s1529_s17, 4294966784  ;;  %s27_s26 = sadd.s32 1, %s2125_s26   ;;  %s3150_s21 = smov %s2109_s22 }
 0x383   : > { %p24_p4 = scmp.ge.s32.totalorder %s27_s26, 4   ;;  %s3151_s22 = smov %s2113_s23 }
 0x384   : > { %s3152_s23 = smov %s2255_s19  ;;  %s3153_s24 = smov %s2121_s25 }
 0x385   : > { %s3154_s25 = smov %s3156_s13  ;;  %26 = sbr.rel (!%p24_p4) target bundleno = 11 (0xb), region = 123 }
 0x38a   :  { %1545 = vsyncpa [#allocation3], 1 }
 0x38b   :  { %1547 = vsyncpa [#allocation3 + $0x1], 1 }
 0x38c   :  { %1548 = vsyncpa [#allocation6], 1 }
 0x38d   :  { %1549 = vsyncpa [#allocation4], 1 }
 0x38e   :  { %1551 = vsyncpa [#allocation4 + $0x1], 1 }
 0x38f   :  { %1552 = vsyncpa [#allocation9], 1 }
 0x390   :  { %1554 = vsyncpa [#allocation9 + $0x1], 1 }

</bundles_post_ra>
